<compile_context>
chip_gen: v7x
topology: tpu7x:2x2x1
jax: 0.10.0
libtpu: 0.0.40
codegen_flags: <defaults>
</compile_context>

<pallas_src>
import functools

import jax
import jax.numpy as jnp
from jax.experimental import pallas as pl
from jax.experimental.pallas import tpu as pltpu


# ---------------------------------------------------------------------------
# Pallas kernel: 16 shifted tap-matmuls (stride folded by space-to-depth)
#                + fused BN/ReLU + global average pool, per batch block.
# ---------------------------------------------------------------------------
def _stem_pool_kernel(x_ref, w_ref, scale_ref, bias_ref, o_ref,
                      *, ho, wo, kt_h, kt_w, inv_hw):
    # x_ref:     (block_b, Hs, Ws, Cs)   space-to-depth input tile (bf16)
    # w_ref:     (kt_h*kt_w, Cs, Cp)     per-tap matmul weights     (bf16)
    # scale_ref: (1, Cp)                 folded BN scale            (f32)
    # bias_ref:  (1, Cp)                 folded BN bias             (f32)
    # o_ref:     (1, block_b, Cp)        pooled features            (f32)
    bt, _, _, cs = x_ref.shape
    cp = o_ref.shape[-1]
    m = bt * ho * wo

    # Load once; slice/reshape in f32 (robust layouts, cheap VPU work),
    # feed the MXU in bf16 with an f32 accumulator.
    xt = x_ref[...].astype(jnp.float32)                      # (bt, Hs, Ws, Cs)

    acc = jnp.zeros((m, cp), jnp.float32)
    for ki in range(kt_h):                                   # 16 unrolled taps
        for kj in range(kt_w):
            tap = ki * kt_w + kj
            lhs = xt[:, ki:ki + ho, kj:kj + wo, :].reshape(m, cs)
            acc = acc + jnp.dot(lhs.astype(jnp.bfloat16), w_ref[tap],
                                preferred_element_type=jnp.float32)

    y = acc * scale_ref[...] + bias_ref[...]                 # fused BN (f32)
    y = jnp.maximum(y, 0.0)                                  # ReLU
    pooled = jnp.sum(y.reshape(bt, ho * wo, cp), axis=1) * inv_hw
    o_ref[...] = pooled.reshape(1, bt, cp).astype(o_ref.dtype)


# ---------------------------------------------------------------------------
# Compact wrapper-side layout transforms (≈1x the input bytes, no im2col).
# ---------------------------------------------------------------------------
def _space_to_depth_input(x, pad, stride):
    """NCHW -> padded, stride-folded NHWC: (B, Hs, Ws, stride*stride*C)."""
    b, c, h, w = x.shape
    hp, wp = h + 2 * pad, w + 2 * pad
    eh, ew = (-hp) % stride, (-wp) % stride                  # extra pad, never read
    xp = jnp.pad(x, ((0, 0), (0, 0), (pad, pad + eh), (pad, pad + ew)))
    xp = jnp.transpose(xp, (0, 2, 3, 1))                     # NHWC
    hs, ws = (hp + eh) // stride, (wp + ew) // stride
    xsd = xp.reshape(b, hs, stride, ws, stride, c)
    xsd = jnp.transpose(xsd, (0, 1, 3, 2, 4, 5))             # (b, a, p, r, t, c)
    return xsd.reshape(b, hs, ws, stride * stride * c), hs, ws


def _space_to_depth_weight(w, stride, c_pad):
    """OIHW conv weight -> per-tap matmul weights (kt_h*kt_w, s*s*C_in, c_pad)."""
    c_out, c_in, kh, kw = w.shape
    khp, kwp = kh + (-kh) % stride, kw + (-kw) % stride
    w8 = jnp.pad(w, ((0, c_pad - c_out), (0, 0), (0, khp - kh), (0, kwp - kw)))
    kt_h, kt_w = khp // stride, kwp // stride
    wr = w8.reshape(c_pad, c_in, kt_h, stride, kt_w, stride)
    wr = jnp.transpose(wr, (2, 4, 3, 5, 1, 0))               # (ki, kj, r, t, c, o)
    return wr.reshape(kt_h * kt_w, stride * stride * c_in, c_pad), kt_h, kt_w


@functools.partial(jax.jit, static_argnames=("stride", "pad", "block_b"))
def cnn_encoder_forward(x, weight, bn_scale, bn_bias, *,
                        stride=2, pad=3, block_b=None):
    """x: (B, n_ch, H, W) NCHW float32.  Returns pooled features (B, out_dim)."""
    b = x.shape[0]
    c_out, _, kh, kw = weight.shape
    h, w = x.shape[2], x.shape[3]
    ho = (h + 2 * pad - kh) // stride + 1
    wo = (w + 2 * pad - kw) // stride + 1
    hw = ho * wo
    c_pad = ((c_out + 127) // 128) * 128                     # lane-dense N

    xsd, hs, ws = _space_to_depth_input(x, pad, stride)
    wsd, kt_h, kt_w = _space_to_depth_weight(weight, stride, c_pad)
    xsd = xsd.astype(jnp.bfloat16)                           # halve DMA bytes
    wsd = wsd.astype(jnp.bfloat16)
    cs = xsd.shape[-1]

    scale2 = jnp.pad(bn_scale, (0, c_pad - c_out)).reshape(1, c_pad).astype(jnp.float32)
    bias2 = jnp.pad(bn_bias, (0, c_pad - c_out)).reshape(1, c_pad).astype(jnp.float32)

    if block_b is None:
        # Largest batch block with M = block_b*HW <= 512 ...
        block_b = 1
        for cand in range(1, b + 1):
            if b % cand == 0 and cand * hw <= 512:
                block_b = cand
        # ... but keep >= 2 grid steps (v7x megacore) if M stays >= 128.
        if b // block_b < 2:
            half = block_b // 2
            if half >= 1 and b % half == 0 and half * hw >= 128:
                block_b = half
    nb = b // block_b

    kernel = functools.partial(_stem_pool_kernel, ho=ho, wo=wo,
                               kt_h=kt_h, kt_w=kt_w, inv_hw=1.0 / hw)

    out = pl.pallas_call(
        kernel,
        out_shape=jax.ShapeDtypeStruct((nb, block_b, c_pad), jnp.float32),
        grid_spec=pltpu.PrefetchScalarGridSpec(
            num_scalar_prefetch=0,
            grid=(nb,),
            in_specs=[
                pl.BlockSpec((block_b, hs, ws, cs), lambda i: (i, 0, 0, 0)),
                pl.BlockSpec(wsd.shape, lambda i: (0, 0, 0)),
                pl.BlockSpec((1, c_pad), lambda i: (0, 0)),
                pl.BlockSpec((1, c_pad), lambda i: (0, 0)),
            ],
            out_specs=pl.BlockSpec((1, block_b, c_pad), lambda i: (i, 0, 0)),
        ),
        compiler_params=pltpu.CompilerParams(
            dimension_semantics=("parallel",),
            vmem_limit_bytes=32 * 1024 * 1024,   # explicit; safe on v7x's 64 MiB
        ),
    )(xsd, wsd, scale2, bias2)

    return out.reshape(b, c_pad)[:, :c_out]                  # drop N padding


# ---------------------------------------------------------------------------
# Deterministic parameter construction (mirrors CNNEncoder.__init__ behavior)
# ---------------------------------------------------------------------------
def make_params(key, n_channels, out_dim, kh=7, kw=7, eps=1e-5):
    k_w, k_g, k_b, k_m, k_v = jax.random.split(key, 5)
    # Pretrained-style stem conv weight for 3 input channels.
    w3 = jax.random.normal(k_w, (out_dim, 3, kh, kw), jnp.float32) * 0.05
    # weight.repeat(1, n_ch // 3 + 1, 1, 1)[:, :n_ch]
    reps = n_channels // 3 + 1
    w = jnp.tile(w3, (1, reps, 1, 1))[:, :n_channels]        # (out_dim, n_ch, kh, kw)
    gamma = 1.0 + 0.1 * jax.random.normal(k_g, (out_dim,), jnp.float32)
    beta = 0.1 * jax.random.normal(k_b, (out_dim,), jnp.float32)
    running_mean = 0.1 * jax.random.normal(k_m, (out_dim,), jnp.float32)
    running_var = 1.0 + 0.1 * jax.random.uniform(k_v, (out_dim,), jnp.float32)
    scale = gamma / jnp.sqrt(running_var + eps)
    bias = beta - running_mean * scale
    return w, scale, bias


def _reference_forward(x, weight, scale, bias, stride=2, pad=3):
    y = jax.lax.conv_general_dilated(
        x, weight, window_strides=(stride, stride),
        padding=((pad, pad), (pad, pad)),
        dimension_numbers=("NCHW", "OIHW", "NCHW"))
    y = y * scale.reshape(1, -1, 1, 1) + bias.reshape(1, -1, 1, 1)
    y = jnp.maximum(y, 0.0)
    return jnp.mean(y, axis=(2, 3))


if __name__ == "__main__":
    key = jax.random.PRNGKey(0)
    k_x, k_p = jax.random.split(key)

    batch, n_channels, spatial, out_dim = 4, 5, 16, 64
    x = jax.random.normal(k_x, (batch, n_channels, spatial, spatial), jnp.float32)
    weight, bn_scale, bn_bias = make_params(k_p, n_channels, out_dim)

    feats = cnn_encoder_forward(x, weight, bn_scale, bn_bias)
    feats = jax.block_until_ready(feats)

    ref = _reference_forward(x, weight, bn_scale, bn_bias)
    assert feats.shape == (batch, out_dim), feats.shape
    max_err = float(jnp.max(jnp.abs(feats - ref)))
    assert jnp.allclose(feats, ref, atol=2e-2, rtol=2e-2), max_err

    print("KERNEL_OK")
</pallas_src>

<mosaic_0001>
module attributes {stable_mosaic.version = 11 : i64} {
  func.func @_stem_pool_kernel(%arg0: i32, %arg1: memref<2x11x11x20xbf16, #tpu.memory_space<vmem>>, %arg2: memref<16x20x128xbf16, #tpu.memory_space<vmem>>, %arg3: memref<1x128xf32, #tpu.memory_space<vmem>>, %arg4: memref<1x128xf32, #tpu.memory_space<vmem>>, %arg5: memref<1x2x128xf32, #tpu.memory_space<vmem>>) attributes {dimension_semantics = [#tpu.dimension_semantics<parallel>], iteration_bounds = array<i64: 2>, scalar_prefetch = 0 : i64, scratch_operands = 0 : i64, tpu.core_type = #tpu.core_type<tc>, window_params = [{transform_indices = @transform_0, window_bounds = array<i64: 2, 11, 11, 20>}, {pipeline_mode = #tpu.pipeline_mode<synchronous>, transform_indices = @transform_1, window_bounds = array<i64: 16, 20, 128>}, {pipeline_mode = #tpu.pipeline_mode<synchronous>, transform_indices = @transform_2, window_bounds = array<i64: 1, 128>}, {pipeline_mode = #tpu.pipeline_mode<synchronous>, transform_indices = @transform_3, window_bounds = array<i64: 1, 128>}, {transform_indices = @transform_4, window_bounds = array<i64: 1, 2, 128>}]} {
    %c0 = arith.constant 0 : index
    %c0_0 = arith.constant 0 : index
    %c0_1 = arith.constant 0 : index
    %c0_2 = arith.constant 0 : index
    %0 = vector.load %arg1[%c0, %c0_0, %c0_1, %c0_2] : memref<2x11x11x20xbf16, #tpu.memory_space<vmem>>, vector<2x11x11x20xbf16>
    %1 = arith.extf %0 : vector<2x11x11x20xbf16> to vector<2x11x11x20xf32>
    %cst = arith.constant 0.000000e+00 : f32
    %2 = vector.broadcast %cst : f32 to vector<128x128xf32>
    %3 = vector.extract_strided_slice %1 {offsets = [0, 0, 0, 0], sizes = [2, 8, 8, 20], strides = [1, 1, 1, 1]} : vector<2x11x11x20xf32> to vector<2x8x8x20xf32>
    %4 = vector.shape_cast %3 : vector<2x8x8x20xf32> to vector<128x20xf32>
    %5 = arith.truncf %4 : vector<128x20xf32> to vector<128x20xbf16>
    %c0_3 = arith.constant 0 : index
    %c0_4 = arith.constant 0 : index
    %c0_5 = arith.constant 0 : index
    %6 = vector.load %arg2[%c0_3, %c0_4, %c0_5] : memref<16x20x128xbf16, #tpu.memory_space<vmem>>, vector<1x20x128xbf16>
    %7 = vector.shape_cast %6 : vector<1x20x128xbf16> to vector<20x128xbf16>
    %cst_6 = arith.constant dense<0.000000e+00> : vector<128x128xf32>
    %8 = tpu.matmul %5, %7, %cst_6 {dimension_numbers = #tpu.dot_dimension_numbers<[1], [0], [0], [1], [0, 0, 1, 1], [], []>} : vector<128x20xbf16>, vector<20x128xbf16>, vector<128x128xf32> -> vector<128x128xf32>
    %9 = arith.addf %2, %8 : vector<128x128xf32>
    %10 = vector.extract_strided_slice %1 {offsets = [0, 0, 1, 0], sizes = [2, 8, 8, 20], strides = [1, 1, 1, 1]} : vector<2x11x11x20xf32> to vector<2x8x8x20xf32>
    %11 = vector.shape_cast %10 : vector<2x8x8x20xf32> to vector<128x20xf32>
    %12 = arith.truncf %11 : vector<128x20xf32> to vector<128x20xbf16>
    %c1 = arith.constant 1 : index
    %c0_7 = arith.constant 0 : index
    %c0_8 = arith.constant 0 : index
    %13 = vector.load %arg2[%c1, %c0_7, %c0_8] : memref<16x20x128xbf16, #tpu.memory_space<vmem>>, vector<1x20x128xbf16>
    %14 = vector.shape_cast %13 : vector<1x20x128xbf16> to vector<20x128xbf16>
    %cst_9 = arith.constant dense<0.000000e+00> : vector<128x128xf32>
    %15 = tpu.matmul %12, %14, %cst_9 {dimension_numbers = #tpu.dot_dimension_numbers<[1], [0], [0], [1], [0, 0, 1, 1], [], []>} : vector<128x20xbf16>, vector<20x128xbf16>, vector<128x128xf32> -> vector<128x128xf32>
    %16 = arith.addf %9, %15 : vector<128x128xf32>
    %17 = vector.extract_strided_slice %1 {offsets = [0, 0, 2, 0], sizes = [2, 8, 8, 20], strides = [1, 1, 1, 1]} : vector<2x11x11x20xf32> to vector<2x8x8x20xf32>
    %18 = vector.shape_cast %17 : vector<2x8x8x20xf32> to vector<128x20xf32>
    %19 = arith.truncf %18 : vector<128x20xf32> to vector<128x20xbf16>
    %c2 = arith.constant 2 : index
    %c0_10 = arith.constant 0 : index
    %c0_11 = arith.constant 0 : index
    %20 = vector.load %arg2[%c2, %c0_10, %c0_11] : memref<16x20x128xbf16, #tpu.memory_space<vmem>>, vector<1x20x128xbf16>
    %21 = vector.shape_cast %20 : vector<1x20x128xbf16> to vector<20x128xbf16>
    %cst_12 = arith.constant dense<0.000000e+00> : vector<128x128xf32>
    %22 = tpu.matmul %19, %21, %cst_12 {dimension_numbers = #tpu.dot_dimension_numbers<[1], [0], [0], [1], [0, 0, 1, 1], [], []>} : vector<128x20xbf16>, vector<20x128xbf16>, vector<128x128xf32> -> vector<128x128xf32>
    %23 = arith.addf %16, %22 : vector<128x128xf32>
    %24 = vector.extract_strided_slice %1 {offsets = [0, 0, 3, 0], sizes = [2, 8, 8, 20], strides = [1, 1, 1, 1]} : vector<2x11x11x20xf32> to vector<2x8x8x20xf32>
    %25 = vector.shape_cast %24 : vector<2x8x8x20xf32> to vector<128x20xf32>
    %26 = arith.truncf %25 : vector<128x20xf32> to vector<128x20xbf16>
    %c3 = arith.constant 3 : index
    %c0_13 = arith.constant 0 : index
    %c0_14 = arith.constant 0 : index
    %27 = vector.load %arg2[%c3, %c0_13, %c0_14] : memref<16x20x128xbf16, #tpu.memory_space<vmem>>, vector<1x20x128xbf16>
    %28 = vector.shape_cast %27 : vector<1x20x128xbf16> to vector<20x128xbf16>
    %cst_15 = arith.constant dense<0.000000e+00> : vector<128x128xf32>
    %29 = tpu.matmul %26, %28, %cst_15 {dimension_numbers = #tpu.dot_dimension_numbers<[1], [0], [0], [1], [0, 0, 1, 1], [], []>} : vector<128x20xbf16>, vector<20x128xbf16>, vector<128x128xf32> -> vector<128x128xf32>
    %30 = arith.addf %23, %29 : vector<128x128xf32>
    %31 = vector.extract_strided_slice %1 {offsets = [0, 1, 0, 0], sizes = [2, 8, 8, 20], strides = [1, 1, 1, 1]} : vector<2x11x11x20xf32> to vector<2x8x8x20xf32>
    %32 = vector.shape_cast %31 : vector<2x8x8x20xf32> to vector<128x20xf32>
    %33 = arith.truncf %32 : vector<128x20xf32> to vector<128x20xbf16>
    %c4 = arith.constant 4 : index
    %c0_16 = arith.constant 0 : index
    %c0_17 = arith.constant 0 : index
    %34 = vector.load %arg2[%c4, %c0_16, %c0_17] : memref<16x20x128xbf16, #tpu.memory_space<vmem>>, vector<1x20x128xbf16>
    %35 = vector.shape_cast %34 : vector<1x20x128xbf16> to vector<20x128xbf16>
    %cst_18 = arith.constant dense<0.000000e+00> : vector<128x128xf32>
    %36 = tpu.matmul %33, %35, %cst_18 {dimension_numbers = #tpu.dot_dimension_numbers<[1], [0], [0], [1], [0, 0, 1, 1], [], []>} : vector<128x20xbf16>, vector<20x128xbf16>, vector<128x128xf32> -> vector<128x128xf32>
    %37 = arith.addf %30, %36 : vector<128x128xf32>
    %38 = vector.extract_strided_slice %1 {offsets = [0, 1, 1, 0], sizes = [2, 8, 8, 20], strides = [1, 1, 1, 1]} : vector<2x11x11x20xf32> to vector<2x8x8x20xf32>
    %39 = vector.shape_cast %38 : vector<2x8x8x20xf32> to vector<128x20xf32>
    %40 = arith.truncf %39 : vector<128x20xf32> to vector<128x20xbf16>
    %c5 = arith.constant 5 : index
    %c0_19 = arith.constant 0 : index
    %c0_20 = arith.constant 0 : index
    %41 = vector.load %arg2[%c5, %c0_19, %c0_20] : memref<16x20x128xbf16, #tpu.memory_space<vmem>>, vector<1x20x128xbf16>
    %42 = vector.shape_cast %41 : vector<1x20x128xbf16> to vector<20x128xbf16>
    %cst_21 = arith.constant dense<0.000000e+00> : vector<128x128xf32>
    %43 = tpu.matmul %40, %42, %cst_21 {dimension_numbers = #tpu.dot_dimension_numbers<[1], [0], [0], [1], [0, 0, 1, 1], [], []>} : vector<128x20xbf16>, vector<20x128xbf16>, vector<128x128xf32> -> vector<128x128xf32>
    %44 = arith.addf %37, %43 : vector<128x128xf32>
    %45 = vector.extract_strided_slice %1 {offsets = [0, 1, 2, 0], sizes = [2, 8, 8, 20], strides = [1, 1, 1, 1]} : vector<2x11x11x20xf32> to vector<2x8x8x20xf32>
    %46 = vector.shape_cast %45 : vector<2x8x8x20xf32> to vector<128x20xf32>
    %47 = arith.truncf %46 : vector<128x20xf32> to vector<128x20xbf16>
    %c6 = arith.constant 6 : index
    %c0_22 = arith.constant 0 : index
    %c0_23 = arith.constant 0 : index
    %48 = vector.load %arg2[%c6, %c0_22, %c0_23] : memref<16x20x128xbf16, #tpu.memory_space<vmem>>, vector<1x20x128xbf16>
    %49 = vector.shape_cast %48 : vector<1x20x128xbf16> to vector<20x128xbf16>
    %cst_24 = arith.constant dense<0.000000e+00> : vector<128x128xf32>
    %50 = tpu.matmul %47, %49, %cst_24 {dimension_numbers = #tpu.dot_dimension_numbers<[1], [0], [0], [1], [0, 0, 1, 1], [], []>} : vector<128x20xbf16>, vector<20x128xbf16>, vector<128x128xf32> -> vector<128x128xf32>
    %51 = arith.addf %44, %50 : vector<128x128xf32>
    %52 = vector.extract_strided_slice %1 {offsets = [0, 1, 3, 0], sizes = [2, 8, 8, 20], strides = [1, 1, 1, 1]} : vector<2x11x11x20xf32> to vector<2x8x8x20xf32>
    %53 = vector.shape_cast %52 : vector<2x8x8x20xf32> to vector<128x20xf32>
    %54 = arith.truncf %53 : vector<128x20xf32> to vector<128x20xbf16>
    %c7 = arith.constant 7 : index
    %c0_25 = arith.constant 0 : index
    %c0_26 = arith.constant 0 : index
    %55 = vector.load %arg2[%c7, %c0_25, %c0_26] : memref<16x20x128xbf16, #tpu.memory_space<vmem>>, vector<1x20x128xbf16>
    %56 = vector.shape_cast %55 : vector<1x20x128xbf16> to vector<20x128xbf16>
    %cst_27 = arith.constant dense<0.000000e+00> : vector<128x128xf32>
    %57 = tpu.matmul %54, %56, %cst_27 {dimension_numbers = #tpu.dot_dimension_numbers<[1], [0], [0], [1], [0, 0, 1, 1], [], []>} : vector<128x20xbf16>, vector<20x128xbf16>, vector<128x128xf32> -> vector<128x128xf32>
    %58 = arith.addf %51, %57 : vector<128x128xf32>
    %59 = vector.extract_strided_slice %1 {offsets = [0, 2, 0, 0], sizes = [2, 8, 8, 20], strides = [1, 1, 1, 1]} : vector<2x11x11x20xf32> to vector<2x8x8x20xf32>
    %60 = vector.shape_cast %59 : vector<2x8x8x20xf32> to vector<128x20xf32>
    %61 = arith.truncf %60 : vector<128x20xf32> to vector<128x20xbf16>
    %c8 = arith.constant 8 : index
    %c0_28 = arith.constant 0 : index
    %c0_29 = arith.constant 0 : index
    %62 = vector.load %arg2[%c8, %c0_28, %c0_29] : memref<16x20x128xbf16, #tpu.memory_space<vmem>>, vector<1x20x128xbf16>
    %63 = vector.shape_cast %62 : vector<1x20x128xbf16> to vector<20x128xbf16>
    %cst_30 = arith.constant dense<0.000000e+00> : vector<128x128xf32>
    %64 = tpu.matmul %61, %63, %cst_30 {dimension_numbers = #tpu.dot_dimension_numbers<[1], [0], [0], [1], [0, 0, 1, 1], [], []>} : vector<128x20xbf16>, vector<20x128xbf16>, vector<128x128xf32> -> vector<128x128xf32>
    %65 = arith.addf %58, %64 : vector<128x128xf32>
    %66 = vector.extract_strided_slice %1 {offsets = [0, 2, 1, 0], sizes = [2, 8, 8, 20], strides = [1, 1, 1, 1]} : vector<2x11x11x20xf32> to vector<2x8x8x20xf32>
    %67 = vector.shape_cast %66 : vector<2x8x8x20xf32> to vector<128x20xf32>
    %68 = arith.truncf %67 : vector<128x20xf32> to vector<128x20xbf16>
    %c9 = arith.constant 9 : index
    %c0_31 = arith.constant 0 : index
    %c0_32 = arith.constant 0 : index
    %69 = vector.load %arg2[%c9, %c0_31, %c0_32] : memref<16x20x128xbf16, #tpu.memory_space<vmem>>, vector<1x20x128xbf16>
    %70 = vector.shape_cast %69 : vector<1x20x128xbf16> to vector<20x128xbf16>
    %cst_33 = arith.constant dense<0.000000e+00> : vector<128x128xf32>
    %71 = tpu.matmul %68, %70, %cst_33 {dimension_numbers = #tpu.dot_dimension_numbers<[1], [0], [0], [1], [0, 0, 1, 1], [], []>} : vector<128x20xbf16>, vector<20x128xbf16>, vector<128x128xf32> -> vector<128x128xf32>
    %72 = arith.addf %65, %71 : vector<128x128xf32>
    %73 = vector.extract_strided_slice %1 {offsets = [0, 2, 2, 0], sizes = [2, 8, 8, 20], strides = [1, 1, 1, 1]} : vector<2x11x11x20xf32> to vector<2x8x8x20xf32>
    %74 = vector.shape_cast %73 : vector<2x8x8x20xf32> to vector<128x20xf32>
    %75 = arith.truncf %74 : vector<128x20xf32> to vector<128x20xbf16>
    %c10 = arith.constant 10 : index
    %c0_34 = arith.constant 0 : index
    %c0_35 = arith.constant 0 : index
    %76 = vector.load %arg2[%c10, %c0_34, %c0_35] : memref<16x20x128xbf16, #tpu.memory_space<vmem>>, vector<1x20x128xbf16>
    %77 = vector.shape_cast %76 : vector<1x20x128xbf16> to vector<20x128xbf16>
    %cst_36 = arith.constant dense<0.000000e+00> : vector<128x128xf32>
    %78 = tpu.matmul %75, %77, %cst_36 {dimension_numbers = #tpu.dot_dimension_numbers<[1], [0], [0], [1], [0, 0, 1, 1], [], []>} : vector<128x20xbf16>, vector<20x128xbf16>, vector<128x128xf32> -> vector<128x128xf32>
    %79 = arith.addf %72, %78 : vector<128x128xf32>
    %80 = vector.extract_strided_slice %1 {offsets = [0, 2, 3, 0], sizes = [2, 8, 8, 20], strides = [1, 1, 1, 1]} : vector<2x11x11x20xf32> to vector<2x8x8x20xf32>
    %81 = vector.shape_cast %80 : vector<2x8x8x20xf32> to vector<128x20xf32>
    %82 = arith.truncf %81 : vector<128x20xf32> to vector<128x20xbf16>
    %c11 = arith.constant 11 : index
    %c0_37 = arith.constant 0 : index
    %c0_38 = arith.constant 0 : index
    %83 = vector.load %arg2[%c11, %c0_37, %c0_38] : memref<16x20x128xbf16, #tpu.memory_space<vmem>>, vector<1x20x128xbf16>
    %84 = vector.shape_cast %83 : vector<1x20x128xbf16> to vector<20x128xbf16>
    %cst_39 = arith.constant dense<0.000000e+00> : vector<128x128xf32>
    %85 = tpu.matmul %82, %84, %cst_39 {dimension_numbers = #tpu.dot_dimension_numbers<[1], [0], [0], [1], [0, 0, 1, 1], [], []>} : vector<128x20xbf16>, vector<20x128xbf16>, vector<128x128xf32> -> vector<128x128xf32>
    %86 = arith.addf %79, %85 : vector<128x128xf32>
    %87 = vector.extract_strided_slice %1 {offsets = [0, 3, 0, 0], sizes = [2, 8, 8, 20], strides = [1, 1, 1, 1]} : vector<2x11x11x20xf32> to vector<2x8x8x20xf32>
    %88 = vector.shape_cast %87 : vector<2x8x8x20xf32> to vector<128x20xf32>
    %89 = arith.truncf %88 : vector<128x20xf32> to vector<128x20xbf16>
    %c12 = arith.constant 12 : index
    %c0_40 = arith.constant 0 : index
    %c0_41 = arith.constant 0 : index
    %90 = vector.load %arg2[%c12, %c0_40, %c0_41] : memref<16x20x128xbf16, #tpu.memory_space<vmem>>, vector<1x20x128xbf16>
    %91 = vector.shape_cast %90 : vector<1x20x128xbf16> to vector<20x128xbf16>
    %cst_42 = arith.constant dense<0.000000e+00> : vector<128x128xf32>
    %92 = tpu.matmul %89, %91, %cst_42 {dimension_numbers = #tpu.dot_dimension_numbers<[1], [0], [0], [1], [0, 0, 1, 1], [], []>} : vector<128x20xbf16>, vector<20x128xbf16>, vector<128x128xf32> -> vector<128x128xf32>
    %93 = arith.addf %86, %92 : vector<128x128xf32>
    %94 = vector.extract_strided_slice %1 {offsets = [0, 3, 1, 0], sizes = [2, 8, 8, 20], strides = [1, 1, 1, 1]} : vector<2x11x11x20xf32> to vector<2x8x8x20xf32>
    %95 = vector.shape_cast %94 : vector<2x8x8x20xf32> to vector<128x20xf32>
    %96 = arith.truncf %95 : vector<128x20xf32> to vector<128x20xbf16>
    %c13 = arith.constant 13 : index
    %c0_43 = arith.constant 0 : index
    %c0_44 = arith.constant 0 : index
    %97 = vector.load %arg2[%c13, %c0_43, %c0_44] : memref<16x20x128xbf16, #tpu.memory_space<vmem>>, vector<1x20x128xbf16>
    %98 = vector.shape_cast %97 : vector<1x20x128xbf16> to vector<20x128xbf16>
    %cst_45 = arith.constant dense<0.000000e+00> : vector<128x128xf32>
    %99 = tpu.matmul %96, %98, %cst_45 {dimension_numbers = #tpu.dot_dimension_numbers<[1], [0], [0], [1], [0, 0, 1, 1], [], []>} : vector<128x20xbf16>, vector<20x128xbf16>, vector<128x128xf32> -> vector<128x128xf32>
    %100 = arith.addf %93, %99 : vector<128x128xf32>
    %101 = vector.extract_strided_slice %1 {offsets = [0, 3, 2, 0], sizes = [2, 8, 8, 20], strides = [1, 1, 1, 1]} : vector<2x11x11x20xf32> to vector<2x8x8x20xf32>
    %102 = vector.shape_cast %101 : vector<2x8x8x20xf32> to vector<128x20xf32>
    %103 = arith.truncf %102 : vector<128x20xf32> to vector<128x20xbf16>
    %c14 = arith.constant 14 : index
    %c0_46 = arith.constant 0 : index
    %c0_47 = arith.constant 0 : index
    %104 = vector.load %arg2[%c14, %c0_46, %c0_47] : memref<16x20x128xbf16, #tpu.memory_space<vmem>>, vector<1x20x128xbf16>
    %105 = vector.shape_cast %104 : vector<1x20x128xbf16> to vector<20x128xbf16>
    %cst_48 = arith.constant dense<0.000000e+00> : vector<128x128xf32>
    %106 = tpu.matmul %103, %105, %cst_48 {dimension_numbers = #tpu.dot_dimension_numbers<[1], [0], [0], [1], [0, 0, 1, 1], [], []>} : vector<128x20xbf16>, vector<20x128xbf16>, vector<128x128xf32> -> vector<128x128xf32>
    %107 = arith.addf %100, %106 : vector<128x128xf32>
    %108 = vector.extract_strided_slice %1 {offsets = [0, 3, 3, 0], sizes = [2, 8, 8, 20], strides = [1, 1, 1, 1]} : vector<2x11x11x20xf32> to vector<2x8x8x20xf32>
    %109 = vector.shape_cast %108 : vector<2x8x8x20xf32> to vector<128x20xf32>
    %110 = arith.truncf %109 : vector<128x20xf32> to vector<128x20xbf16>
    %c15 = arith.constant 15 : index
    %c0_49 = arith.constant 0 : index
    %c0_50 = arith.constant 0 : index
    %111 = vector.load %arg2[%c15, %c0_49, %c0_50] : memref<16x20x128xbf16, #tpu.memory_space<vmem>>, vector<1x20x128xbf16>
    %112 = vector.shape_cast %111 : vector<1x20x128xbf16> to vector<20x128xbf16>
    %cst_51 = arith.constant dense<0.000000e+00> : vector<128x128xf32>
    %113 = tpu.matmul %110, %112, %cst_51 {dimension_numbers = #tpu.dot_dimension_numbers<[1], [0], [0], [1], [0, 0, 1, 1], [], []>} : vector<128x20xbf16>, vector<20x128xbf16>, vector<128x128xf32> -> vector<128x128xf32>
    %114 = arith.addf %107, %113 : vector<128x128xf32>
    %c0_52 = arith.constant 0 : index
    %c0_53 = arith.constant 0 : index
    %115 = vector.load %arg3[%c0_52, %c0_53] : memref<1x128xf32, #tpu.memory_space<vmem>>, vector<1x128xf32>
    %116 = vector.broadcast %115 : vector<1x128xf32> to vector<128x128xf32>
    %117 = arith.mulf %114, %116 : vector<128x128xf32>
    %c0_54 = arith.constant 0 : index
    %c0_55 = arith.constant 0 : index
    %118 = vector.load %arg4[%c0_54, %c0_55] : memref<1x128xf32, #tpu.memory_space<vmem>>, vector<1x128xf32>
    %119 = vector.broadcast %118 : vector<1x128xf32> to vector<128x128xf32>
    %120 = arith.addf %117, %119 : vector<128x128xf32>
    %cst_56 = arith.constant 0.000000e+00 : f32
    %121 = vector.broadcast %cst_56 : f32 to vector<128x128xf32>
    %122 = arith.maximumf %120, %121 : vector<128x128xf32>
    %123 = vector.shape_cast %122 : vector<128x128xf32> to vector<2x64x128xf32>
    %cst_57 = arith.constant dense<0.000000e+00> : vector<2x128xf32>
    %124 = vector.multi_reduction <add>, %123, %cst_57 [1] : vector<2x64x128xf32> to vector<2x128xf32>
    %cst_58 = arith.constant 1.562500e-02 : f32
    %125 = vector.broadcast %cst_58 : f32 to vector<2x128xf32>
    %126 = arith.mulf %124, %125 : vector<2x128xf32>
    %127 = vector.shape_cast %126 : vector<2x128xf32> to vector<1x2x128xf32>
    %c0_59 = arith.constant 0 : index
    %c0_60 = arith.constant 0 : index
    %c0_61 = arith.constant 0 : index
    %128 = vector.load %arg5[%c0_59, %c0_60, %c0_61] : memref<1x2x128xf32, #tpu.memory_space<vmem>>, vector<1x2x128xf32>
    tpu.vector_store %arg5[%c0_59, %c0_60, %c0_61], %127 {strides = array<i32>} : memref<1x2x128xf32, #tpu.memory_space<vmem>>, vector<1x2x128xf32>,
    return
  }
  func.func @transform_0(%arg0: i32) -> (i32, i32, i32, i32) {
    %c0_i32 = arith.constant 0 : i32
    %c0_i32_0 = arith.constant 0 : i32
    %c0_i32_1 = arith.constant 0 : i32
    %c0_i32_2 = arith.constant 0 : i32
    return %arg0, %c0_i32, %c0_i32_0, %c0_i32_1 : i32, i32, i32, i32
  }
  func.func @transform_1(%arg0: i32) -> (i32, i32, i32) {
    %c0_i32 = arith.constant 0 : i32
    %c0_i32_0 = arith.constant 0 : i32
    %c0_i32_1 = arith.constant 0 : i32
    %c0_i32_2 = arith.constant 0 : i32
    return %c0_i32, %c0_i32_0, %c0_i32_1 : i32, i32, i32
  }
  func.func @transform_2(%arg0: i32) -> (i32, i32) {
    %c0_i32 = arith.constant 0 : i32
    %c0_i32_0 = arith.constant 0 : i32
    %c0_i32_1 = arith.constant 0 : i32
    return %c0_i32, %c0_i32_0 : i32, i32
  }
  func.func @transform_3(%arg0: i32) -> (i32, i32) {
    %c0_i32 = arith.constant 0 : i32
    %c0_i32_0 = arith.constant 0 : i32
    %c0_i32_1 = arith.constant 0 : i32
    return %c0_i32, %c0_i32_0 : i32, i32
  }
  func.func @transform_4(%arg0: i32) -> (i32, i32, i32) {
    %c0_i32 = arith.constant 0 : i32
    %c0_i32_0 = arith.constant 0 : i32
    %c0_i32_1 = arith.constant 0 : i32
    return %arg0, %c0_i32, %c0_i32_0 : i32, i32, i32
  }
}

</mosaic_0001>

<bundles_post_ra>
// kernel: cnn_encoder_forward.1
= control target key start
LH: loop header
LB: loop body
LE: loop exit
PB: predicated region body
PF: predicated region fallthrough
CT: control target
= control target key end

     0   :  { %9 = vsyncpa [#allocation3], 0  ;;  %s5601_s0 = inlined_call_operand.vmem [shape: bf16[4,11,11,20], index: 0, kind: input, shape index: {}]   ;;  %s5602_s1 = inlined_call_operand.vmem [shape: bf16[16,20,128], index: 1, kind: input, shape index: {}]   ;;  %s5603_s2 = inlined_call_operand.vmem [shape: f32[1,128], index: 2, kind: input, shape index: {}]   ;;  %s5604_s3 = inlined_call_operand.vmem [shape: f32[1,128], index: 3, kind: input, shape index: {}]   ;;  %s5605_s4 = inlined_call_operand.hbm [shape: f32[2,2,128], index: 4, kind: output, shape index: {}]  }
   0x1   :  { %11 = vsyncpa [#allocation3 + $0x1], 0  ;;  %s4279_s15 = smov 0   ;;  %s4281_s16 = smov 0  }
   0x2   :  { %s4283_s17 = smov 0   ;;  %s4285_s18 = smov 0  }
   0x3 LB: > { %s4300_s19 = sadd.s32 4294967295, %s4251_s18   ;;  %s3123_s20 = sadd.s32 4294967294, %s4251_s18   ;;  %s4251_s18 = sphi %s4285_s18, %s5864_s18   ;;  %s4247_s17 = sphi %s4283_s17, %s5863_s17   ;;  %s4243_s16 = sphi %s4281_s16, %s5862_s16   ;;  %s4239_s15 = sphi %s4279_s15, %s5861_s15  }
   0x4   : > { %s4304_s21 = sadd.s32 1, %s4251_s18   ;;  %s113_s22 = sadd.s32 1, %s4247_s17 }
   0x5   : > { %s110_s23 = ssub.s32 %s4251_s18, %s4304_s21  ;;  %p123_p0 = scmp.ne.s32.totalorder %s4247_s17, %s4243_s16 }
   0x6   : > { %p111_p1 = scmp.eq.s32.totalorder %s110_s23, 0  ;;  %p124_p2 = scmp.eq.s32.totalorder %s4300_s19, 1 }
   0x7   : > { %p129_p3 = scmp.ne.s32.totalorder %s4243_s16, %s4239_s15  ;;  %p130_p4 = scmp.eq.s32.totalorder %s3123_s20, 1 }
   0x8   : > { %s4315_s24 = scalar_select %p111_p1, %s4247_s17, %s113_s22  }
   0x9   : > { %p4317_p5 = por %p124_p2, %p123_p0  ;;  %p4321_p6 = por %p130_p4, %p129_p3 }
   0xa   : > { %p3126_p7 = scmp.ge.s32.totalorder %s4251_s18, 1  ;;  %p167_p8 = scmp.lt.s32.totalorder %s4251_s18, 3 }
   0xc   : > { %p168_p9 = pnand %p3126_p7, %p167_p8 }
   0xe   : > { %171 = sbr.rel (%p168_p9) target bundleno = 546 (0x222), region = 36 }
  0x15   : > { %v4137_v0 = vld [vmem:[%s5602_s1 + $0x60] sm:$0xff]   ;;  %vm444_vm0 = vcmask 1041408   ;;  %v4138_v1 = vld [vmem:[%s5602_s1 + $0xc] sm:$0xff]   ;;  %s3128_s5 = sshll.u32 %s4300_s19, 1  ;;  %vm419_vm1 = vcmask 162816   ;;  %vm333_vm2 = vcmask 1046528  }
  0x16   : > { %3681 = vmatprep.subr.bf16.mxu0 %v4137_v0  ;;  %v4139_v2 = vld [vmem:[%s5602_s1 + $0x68] ss:$0 sps:$4 sm:$0x33]   ;;  %p195_p10 = scmp.lt.s32.totalorder %s3128_s5, 3  ;;  %3521 = vmatprep.subr.bf16.mxu1 %v4138_v1  ;;  %v4345_v5 = vld [vmem:[%s5602_s1] sm:$0xff]   ;;  %v4146_v7 = vld [vmem:[%s5602_s1 + $0x6c] sm:$0xff]  }
  0x17   : > { %3682 = vmatpush3.bf16.msra.mxu0 %v4137_v0  ;;  %v4143_v3 = vld [vmem:[%s5602_s1 + $0x14] ss:$0 sps:$4 sm:$0x33]   ;;  %3522 = vmatpush3.bf16.msra.mxu1 %v4138_v1  ;;  %v1824_v4 = vsel %vm444_vm0, %v4139_v2, 0  ;;  %v4589_v16 = vld [vmem:[%s5602_s1 + $0x78] sm:$0xff]   ;;  %vm678_vm3 = vcmask 1045504  }
  0x18   : > { %4089 = vmatprep.subr.msk.bf16.mxu0 %vm444_vm0, %v4139_v2  ;;  %s5866_s5 = smov (!%p195_p10, %s3128_s5), 3  ;;  %4081 = vmatprep.subr.msk.bf16.mxu1 %vm444_vm0, %v4143_v3  ;;  %v446_v6 = vsel %vm444_vm0, %v4143_v3, 0  ;;  %v4396_v25 = vld [vmem:[%s5602_s1 + $0x74] ss:$0 sps:$4 sm:$0x33]   ;;  %vm904_vm4 = vcmask 1044480  }
  0x19   : > { %s4097_s14 = smul.u32 88, %s5866_s5  ;;  %v4479_v1 = vld [vmem:[%s5602_s1 + $0x8] ss:$0 sps:$4 sm:$0x33]   ;;  %s191_s6 = sand.u32 1, %s4243_s16   ;;  %vm3046_vm5 = vcmask 1041409  }
  0x1a   : > { %s3127_s7 = sshll.u32 %s191_s6, 1  ;;  %s3358_s8 = sshll.u32 %s4300_s19, 5 }
  0x1b   : > { %3684 = vmatpush3.bf16.msra.mxu0 %v1824_v4  ;;  %s4355_s23 = scalar_lea.vmem %s5601_s0, %s4097_s14  ;;  %3524 = vmatpush3.bf16.msra.mxu1 %v446_v6  ;;  %s193_s9 = scalar_lea.vmem [#allocation2], %s3127_s7 }
  0x1c   : > { %3701 = vmatprep.subr.bf16.mxu0 %v4146_v7  ;;  %v4358_v8 = vld [vmem:[%s4355_s23 + $0x8] sm:$0xf]  ;;  %v4361_v9 = vld [vmem:[%s4355_s23 + $0x10] sm:$0xf]  ;;  %v208_v10 = vld [vmem:[%s4355_s23 + $0x18] sm:$0xf]  ;;  %3541 = vmatprep.subr.bf16.mxu1 %v4345_v5  ;;  %s5559_s13 = scalar_lea.hbm %s5605_s4, %s3358_s8 }
  0x1d   : > { %5696 = vst [vmem:[#allocation5_spill] sm:$0xff] %v4358_v8  ;;  %5697 = vst [vmem:[#allocation6_spill] sm:$0xff] %v4361_v9  ;;  %v210_v11 = vld [vmem:[%s4355_s23 + $0x20] sm:$0xf]  ;;  %v4366_v12 = vunpack.c.l.bf16 %v208_v10  ;;  %v4369_v13 = vcombine.low %v4361_v9, %v208_v10  ;;  %v212_v14 = vld [vmem:[%s4355_s23 + $0x28] sm:$0xf]  ;;  %v4373_v15 = vunpack.c.l.bf16 %v4358_v8  ;;  %v4384_v20 = vunpack.c.l.bf16 %v4361_v9 }
  0x1e   : > { %v4377_v17 = vcombine.low %v208_v10, %v210_v11  ;;  %v4380_v18 = vld [vmem:[%s4355_s23] sm:$0xf]  ;;  %v203_v19 = vld [vmem:[%s4355_s23 + $0x4] sm:$0x3]  ;;  %v205_v21 = vld [vmem:[%s4355_s23 + $0xc] sm:$0x3]  ;;  %v4391_v24 = vcombine.low %v210_v11, %v212_v14  ;;  %v4398_v26 = vunpack.c.l.bf16 %v210_v11  ;;  %v4419_v36 = vunpack.c.l.bf16 %v212_v14 }
  0x1f   : > { %3685 = vmatprep.mubr.msk.bf16.mxu0 %vm419_vm1, %v4369_v13  ;;  %v207_v22 = vld [vmem:[%s4355_s23 + $0x14] sm:$0x3]  ;;  %v209_v23 = vld [vmem:[%s4355_s23 + $0x1c] sm:$0x3]  ;;  %v343_v27 = vrot.slane %v4366_v12, 1  ;;  %v4402_v28 = vunpack.c.l.bf16 %v4380_v18  ;;  %v4404_v29 = vunpack.c.l.bf16 %v203_v19  ;;  %v4409_v31 = vunpack.c.l.bf16 %v205_v21  ;;  %s3064_s10 = sshll.u32 %s193_s9, 4  ;;  %s5561_s10 = int_to_ptr.vmem [resolvable:$true] %s3064_s10 }
  0x20   : > { %5698 = vst [vmem:[#allocation7_spill] sm:$0xff] %v4377_v17  ;;  %v214_v30 = vld [vmem:[%s4355_s23 + $0x30] sm:$0xf]  ;;  %3686 = vmatmul.mubr.msk.bf16.vlgmr.msra.gmra.mrb[0].mxu0 %vm419_vm1, %v4391_v24  ;;  %v4411_v32 = vunpack.c.l.bf16 %v207_v22  ;;  %v4413_v33 = vunpack.c.l.bf16 %v209_v23  ;;  %v337_v34 = vrot.slane %v4373_v15, 1  ;;  %v4417_v35 = vld [vmem:[%s4355_s23 + $0x38] sm:$0xf] }
  0x21   : > { %5699 = vst [vmem:[#allocation8_spill] sm:$0xff] %v4417_v35  ;;  %v334_v37 = vrot.slane %v4402_v28, 1  ;;  %v335_v38 = vrot.slane %v4404_v29, 1  ;;  %v340_v39 = vrot.slane %v4384_v20, 1  ;;  %3702 = vmatpush3.bf16.msra.mxu0 %v4146_v7  ;;  %v4425_v40 = vld [vmem:[%s4355_s23 + $0x40] sm:$0xf]  ;;  %v4430_v44 = vunpack.c.l.bf16 %v214_v30 }
  0x22   : > { %5700 = vst [vmem:[#allocation9_spill] sm:$0xff] %v4425_v40  ;;  %v338_v41 = vrot.slane %v4409_v31, 1  ;;  %v341_v42 = vrot.slane %v4411_v32, 1  ;;  %v344_v43 = vrot.slane %v4413_v33, 1  ;;  %v4433_v45 = vld [vmem:[%s4355_s23 + $0x48] sm:$0xf]  ;;  %4090 = vmatprep.subr.msk.bf16.mxu0 %vm444_vm0, %v4396_v25  ;;  %v4439_v47 = vunpack.c.l.bf16 %v4417_v35 }
  0x23   : > { %5701 = vst [vmem:[#allocation10_spill] sm:$0xff] %v4430_v44  ;;  %5702 = vst [vmem:[#allocation11_spill] sm:$0xff] %v4433_v45  ;;  %v336_v46 = vsel %vm333_vm2, %v334_v37, %v335_v38  ;;  %v4442_v48 = vcombine.low %v214_v30, %v4417_v35  ;;  %v4444_v49 = vcombine.low %v212_v14, %v214_v30  ;;  %v211_v50 = vld [vmem:[%s4355_s23 + $0x24] sm:$0x3]  ;;  %v213_v51 = vld [vmem:[%s4355_s23 + $0x2c] sm:$0x3] }
  0x24   : > { %v4449_v52 = vsel %vm333_vm2, %v337_v34, %v338_v41  ;;  %v4452_v53 = vsel %vm333_vm2, %v340_v39, %v341_v42  ;;  %v4455_v54 = vsel %vm333_vm2, %v343_v27, %v344_v43  ;;  %v215_v55 = vld [vmem:[%s4355_s23 + $0x34] sm:$0x3]  ;;  %v217_v56 = vld [vmem:[%s4355_s23 + $0x3c] sm:$0x3]  ;;  %v3247_v60 = vcombine.low %v4425_v40, %v4433_v45  ;;  %v4489_v7 = vld [vmem:[%s4355_s23 + $0x68] sm:$0xf] }
  0x25   : > { %5703 = vst [vmem:[#allocation12_spill] sm:$0xff] %v4444_v49  ;;  %5704 = vst [vmem:[#allocation13_spill] sm:$0xff] %v4449_v52  ;;  %v398_v57 = vpack.c.bf16 %v4449_v52, %v336_v46  ;;  %v4462_v58 = vpack.c.bf16 %v4455_v54, %v4452_v53  ;;  %3689 = vmatprep.mubr.msk.bf16.mxu0 %vm419_vm1, %v4442_v48  ;;  %v4470_v61 = vunpack.c.l.bf16 %v211_v50  ;;  %v4472_v62 = vunpack.c.l.bf16 %v213_v51  ;;  %v4492_v10 = vld [vmem:[%s4355_s23 + $0x70] sm:$0xf]  ;;  %v4500_v19 = vld [vmem:[%s4355_s23 + $0x78] sm:$0xf] }
  0x26   : > { %5705 = vst [vmem:[#allocation14_spill] sm:$0xff] %v4452_v53  ;;  %5706 = vst [vmem:[#allocation15_spill] sm:$0xff] %v4455_v54  ;;  %v346_v63 = vrot.slane %v4398_v26, 1  ;;  %v349_v0 = vrot.slane %v4419_v36, 1  ;;  %v4482_v2 = vunpack.c.l.bf16 %v215_v55  ;;  %v4484_v3 = vunpack.c.l.bf16 %v217_v56  ;;  %v4503_v21 = vld [vmem:[%s4355_s23 + $0x80] sm:$0xf] }
  0x27   : > { %3525 = vmatprep.mubr.msk.bf16.mxu1 %vm419_vm1, %v398_v57  ;;  %v352_v4 = vrot.slane %v4430_v44, 1  ;;  %v355_v6 = vrot.slane %v4439_v47, 1  ;;  %5708 = vst [vmem:[#allocation17_spill] sm:$0xff] %v4489_v7  ;;  %5709 = vst [vmem:[#allocation18_spill] sm:$0xff] %v4492_v10  ;;  %v347_v11 = vrot.slane %v4470_v61, 1  ;;  %v350_v14 = vrot.slane %v4472_v62, 1 }
  0x28   : > { %5707 = vst [vmem:[#allocation16_spill] sm:$0xff] %v4482_v2  ;;  %3526 = vmatmul.mubr.msk.bf16.vlgmr.msra.gmra.mrb[0].mxu1 %vm419_vm1, %v4462_v58  ;;  %3690 = vmatmul.mubr.msk.bf16.gmra.mrb[4].mxu0 %vm419_vm1, %v3247_v60  ;;  %5710 = vst [vmem:[#allocation19_spill] sm:$0xff] %v4500_v19  ;;  %v353_v22 = vrot.slane %v4482_v2, 1  ;;  %v356_v23 = vrot.slane %v4484_v3, 1  ;;  %v4509_v27 = vld [vmem:[%s4355_s23 + $0x58] sm:$0xf]  ;;  %v4517_v38 = vunpack.c.l.bf16 %v4489_v7  ;;  %v4520_v39 = vunpack.c.l.bf16 %v4492_v10 }
  0x29   : > { %5711 = vst [vmem:[#allocation20_spill] sm:$0xff] %v4503_v21  ;;  %3542 = vmatpush3.bf16.msra.mxu1 %v4345_v5  ;;  %v225_v30 = vld [vmem:[%s4355_s23 + $0x5c] sm:$0x3]  ;;  %v4513_v34 = vsel %vm333_vm2, %v346_v63, %v347_v11  ;;  %v351_v37 = vsel %vm333_vm2, %v349_v0, %v350_v14  ;;  %v4523_v5 = vld [vmem:[%s4355_s23 + $0x60] sm:$0xf]  ;;  %v4538_v51 = vcombine.low %v4489_v7, %v4492_v10  ;;  %v4547_v60 = vunpack.c.l.bf16 %v4500_v19  ;;  %s3051_s14 = scalar_lea.sflag [#allocation3], %s191_s6 }
  0x2a   : > { %5712 = vst [vmem:[#allocation21_spill] sm:$0xff] %v4513_v34  ;;  %5713 = vst [vmem:[#allocation22_spill] sm:$0xff] %v4523_v5  ;;  %v227_v41 = vld [vmem:[%s4355_s23 + $0x64] sm:$0x3]  ;;  %4082 = vmatprep.subr.msk.bf16.mxu1 %vm444_vm0, %v4479_v1  ;;  %v229_v42 = vld [vmem:[%s4355_s23 + $0x6c] sm:$0x3]  ;;  %v4530_v43 = vpack.c.bf16 %v351_v37, %v4513_v34  ;;  %v354_v46 = vsel %vm333_vm2, %v352_v4, %v353_v22  ;;  %v4534_v50 = vsel %vm333_vm2, %v355_v6, %v356_v23 }
  0x2b   : > { %5714 = vst [vmem:[#allocation23_spill] sm:$0xff] %v4534_v50  ;;  %5715 = vst [vmem:[#allocation24_spill] sm:$0xff] %v4538_v51  ;;  %v231_v55 = vld [vmem:[%s4355_s23 + $0x74] sm:$0x3]  ;;  %v4542_v56 = vpack.c.bf16 %v4534_v50, %v354_v46  ;;  %v4544_v57 = vpack.c.bf16 %v354_v46, %v351_v37  ;;  %v4550_v63 = vunpack.c.l.bf16 %v4503_v21  ;;  %3693 = vmatprep.mubr.msk.bf16.mxu0 %vm419_vm1, %v4538_v51  ;;  %v4561_v4 = vunpack.c.l.bf16 %v4509_v27  ;;  %v4569_v14 = vld [vmem:[%s4355_s23 + $0x88] sm:$0xf] }
  0x2c   : > { %3529 = vmatprep.mubr.msk.bf16.mxu1 %vm419_vm1, %v4530_v43  ;;  %v4558_v0 = vcombine.low %v4500_v19, %v4503_v21  ;;  %v4563_v6 = vunpack.c.l.bf16 %v225_v30  ;;  %v4566_v11 = vunpack.c.l.bf16 %v4523_v5  ;;  %5718 = vst [vmem:[#allocation27_spill] sm:$0xff] %v4569_v14  ;;  %v4574_v22 = vld [vmem:[%s5602_s1 + $0x18] sm:$0xff]   ;;  %v4576_v23 = vunpack.c.l.bf16 %v227_v41  ;;  %v4584_v59 = vld [vmem:[%s4355_s23 + $0x90] sm:$0xf]  ;;  %v235_v49 = vld [vmem:[%s4355_s23 + $0x84] sm:$0x3] }
  0x2d   : > { %5716 = vst [vmem:[#allocation25_spill] sm:$0xff] %v4544_v57  ;;  %v4578_v37 = vunpack.c.l.bf16 %v229_v42  ;;  %v4580_v46 = vunpack.c.l.bf16 %v231_v55  ;;  %v364_v30 = vrot.slane %v4517_v38, 1  ;;  %5720 = vst [vmem:[#allocation29_spill] sm:$0xff] %v4584_v59  ;;  %v358_v52 = vrot.slane %v4561_v4, 1  ;;  %v4596_v53 = vld [vmem:[%s4355_s23 + $0x98] sm:$0xf] }
  0x2e   : > { %5717 = vst [vmem:[#allocation26_spill] sm:$0xff] %v4558_v0  ;;  %5719 = vst [vmem:[#allocation28_spill] sm:$0xff] %v4576_v23  ;;  %v359_v41 = vrot.slane %v4563_v6, 1  ;;  %v361_v42 = vrot.slane %v4566_v11, 1  ;;  %v367_v55 = vrot.slane %v4520_v39, 1  ;;  %v362_v17 = vrot.slane %v4576_v23, 1 }
  0x2f   : > { %5721 = vst [vmem:[#allocation30_spill] sm:$0xff] %v4596_v53  ;;  %v4599_v57 = vld [vmem:[%s4355_s23 + $0xa0] sm:$0xf]  ;;  %v233_v9 = vld [vmem:[%s4355_s23 + $0x7c] sm:$0x3]  ;;  %v365_v50 = vrot.slane %v4578_v37, 1  ;;  %v4618_v35 = vunpack.c.l.bf16 %v4569_v14  ;;  %v4621_v23 = vunpack.c.l.bf16 %v4584_v59 }
  0x30   : > { %5722 = vst [vmem:[#allocation31_spill] sm:$0xff] %v4599_v57  ;;  %3530 = vmatmul.mubr.msk.bf16.gmra.mrb[4].mxu1 %vm419_vm1, %v4542_v56  ;;  %3694 = vmatmul.mubr.msk.bf16.gmra.mrb[8].mxu0 %vm419_vm1, %v4558_v0  ;;  %v368_v34 = vrot.slane %v4580_v46, 1  ;;  %v579_v54 = vsel %vm444_vm0, %v4479_v1, 0  ;;  %v237_v7 = vld [vmem:[%s4355_s23 + $0x8c] sm:$0x3]  ;;  %v360_v10 = vsel %vm333_vm2, %v358_v52, %v359_v41  ;;  %v1973_v19 = vsel %vm444_vm0, %v4396_v25, 0 }
  0x31   : > { %v239_v21 = vld [vmem:[%s4355_s23 + $0x94] sm:$0x3]  ;;  %3544 = vmatpush3.bf16.msra.mxu1 %v579_v54  ;;  %5723 = vst [vmem:[#allocation32_spill] sm:$0xff] %v4618_v35  ;;  %5724 = vst [vmem:[#allocation33_spill] sm:$0xff] %v4621_v23  ;;  %v4624_v0 = vsel %vm333_vm2, %v361_v42, %v362_v17  ;;  %v4627_v1 = vsel %vm333_vm2, %v364_v30, %v365_v50  ;;  %3704 = vmatpush3.bf16.msra.mxu0 %v1973_v19  ;;  %v4650_v50 = vunpack.c.l.bf16 %v233_v9  ;;  %v221_v42 = vld [vmem:[%s4355_s23 + $0x4c] sm:$0x3] }
  0x32   : > { %5725 = vst [vmem:[#allocation34_spill] sm:$0xff] %v4624_v0  ;;  %5726 = vst [vmem:[#allocation35_spill] sm:$0xff] %v4627_v1  ;;  %v4630_v52 = vsel %vm333_vm2, %v367_v55, %v368_v34  ;;  %v4634_v25 = vcombine.low %v4569_v14, %v4584_v59  ;;  %v402_v51 = vpack.c.bf16 %v4624_v0, %v360_v10  ;;  %3561 = vmatprep.subr.bf16.mxu1 %v4574_v22  ;;  %v219_v34 = vld [vmem:[%s4355_s23 + $0x44] sm:$0x3]  ;;  %s4189_s20 = scalar_lea.vmem %s5561_s10, 32  ;;  %s4253_s19 = smov [#allocation2]  }
  0x33   : > { %5727 = vst [vmem:[#allocation36_spill] sm:$0xff] %v4630_v52  ;;  %v4641_v17 = vpack.c.bf16 %v4630_v52, %v4627_v1  ;;  %3721 = vmatprep.subr.bf16.mxu0 %v4589_v16  ;;  %v3248_v19 = vcombine.low %v4596_v53, %v4599_v57  ;;  %v4652_v30 = vunpack.c.l.bf16 %v235_v49  ;;  %v370_v10 = vrot.slane %v4547_v60, 1  ;;  %p4190_p11 = scmp.ne.s32.totalorder %s5561_s10, %s4189_s20  ;;  %s4193_s22 = sshll.u32 %s4253_s19, 4  ;;  %s4194_s22 = int_to_ptr.vmem [resolvable:$false] %s4193_s22 }
  0x34   : > { %5728 = vst [vmem:[#allocation37_spill] sm:$0xff] %v4634_v25  ;;  %3697 = vmatprep.mubr.msk.bf16.mxu0 %vm419_vm1, %v4634_v25  ;;  %3533 = vmatprep.mubr.msk.bf16.mxu1 %vm419_vm1, %v402_v51  ;;  %v373_v55 = vrot.slane %v4550_v63, 1  ;;  %v4658_v41 = vunpack.c.l.bf16 %v237_v7  ;;  %v4660_v54 = vunpack.c.l.bf16 %v239_v21  ;;  %v376_v1 = vrot.slane %v4618_v35, 1  ;;  %s4195_s27 = scalar_lea.vmem %s4194_s22, 64  ;;  %p4196_p0 = scmp.lt.s32.totalorder %s5561_s10, %s4194_s22 }
  0x35   : > { %v371_v9 = vrot.slane %v4650_v50, 1  ;;  %v374_v49 = vrot.slane %v4652_v30, 1  ;;  %v379_v52 = vrot.slane %v4621_v23, 1  ;;  %v4668_v59 = vunpack.c.l.bf16 %v4425_v40  ;;  %v4161_v40 = vld [vmem:[%s5602_s1 + $0x80] ss:$0 sps:$4 sm:$0x33]   ;;  %p4191_p12 = pnand %p4190_p11, %p4317_p5  ;;  %p4197_p1 = scmp.lt.s32.totalorder %s4195_s27, %s4189_s20 }
  0x36   : > { %5729 = vst [vmem:[#allocation38_spill] sm:$0xff] %v4658_v41  ;;  %5730 = vst [vmem:[#allocation39_spill] sm:$0xff] %v4660_v54  ;;  %v4671_v51 = vunpack.c.l.bf16 %v4433_v45  ;;  %v377_v7 = vrot.slane %v4658_v41, 1  ;;  %v380_v21 = vrot.slane %v4660_v54, 1  ;;  %v4684_v25 = vunpack.c.l.bf16 %v219_v34  ;;  %v241_v34 = vld [vmem:[%s4355_s23 + $0x9c] sm:$0x3] }
  0x37   : > { %v4679_v0 = vsel %vm333_vm2, %v370_v10, %v371_v9  ;;  %v4682_v14 = vsel %vm333_vm2, %v373_v55, %v374_v49  ;;  %v4686_v45 = vunpack.c.l.bf16 %v221_v42  ;;  %v691_v54 = vrot.slane %v4398_v26, 2  ;;  %v243_v42 = vld [vmem:[%s4355_s23 + $0xa4] sm:$0x3]  ;;  %p4192_p13 = pneg %p4191_p12  ;;  %p4198_p2 = por %p4197_p1, %p4196_p0 }
  0x38   : > { %3534 = vmatmul.mubr.msk.bf16.gmra.mrb[8].mxu1 %vm419_vm1, %v4641_v17  ;;  %3698 = vmatmul.mubr.msk.bf16.gmra.mrb[12].mxu0 %vm419_vm1, %v3248_v19  ;;  %5731 = vst [vmem:[#allocation40_spill] sm:$0xff] %v4679_v0  ;;  %5732 = vst [vmem:[#allocation41_spill] sm:$0xff] %v4682_v14  ;;  %v4694_v23 = vpack.c.bf16 %v4682_v14, %v4679_v0  ;;  %v4697_v19 = vsel %vm333_vm2, %v376_v1, %v377_v7  ;;  %v4707_v55 = vunpack.c.l.bf16 %v4596_v53 }
  0x39   : > { %5734 = vst [vmem:[#allocation43_spill] sm:$0xff] %v4697_v19  ;;  %v4700_v10 = vsel %vm333_vm2, %v379_v52, %v380_v21  ;;  %3705 = vmatprep.mubr.msk.bf16.mxu0 %vm419_vm1, %v4462_v58  ;;  %v4710_v9 = vunpack.c.l.bf16 %v4599_v57  ;;  %v1295_v1 = vrot.slane %v4668_v59, 1  ;;  %v1943_v49 = vrot.slane %v4671_v51, 1  ;;  %p4199_p3 = pnand %p4198_p2, %p4192_p13 }
  0x3a   : > { %5733 = vst [vmem:[#allocation42_spill] sm:$0xff] %v4694_v23  ;;  %5735 = vst [vmem:[#allocation44_spill] sm:$0xff] %v4700_v10  ;;  %3537 = vmatprep.mubr.msk.bf16.mxu1 %vm419_vm1, %v4694_v23  ;;  %v4718_v52 = vpack.c.bf16 %v4700_v10, %v4697_v19  ;;  %v1296_v58 = vrot.slane %v4684_v25, 1  ;;  %v1944_v7 = vrot.slane %v4686_v45, 1  ;;  %v4722_v21 = vunpack.c.l.bf16 %v241_v34 }
  0x3b   : > { %5736 = vst [vmem:[#allocation45_spill] sm:$0xff] %v4707_v55  ;;  %5737 = vst [vmem:[#allocation46_spill] sm:$0xff] %v4710_v9  ;;  %v3130_v57 = vcombine.low %v4380_v18, %v4358_v8  ;;  %v4728_v53 = vunpack.c.l.bf16 %v243_v42  ;;  %v694_v41 = vrot.slane %v4419_v36, 2  ;;  %v692_v10 = vrot.slane %v4470_v61, 2 }
  0x3c   : > { %5738 = vst [vmem:[#allocation47_spill] sm:$0xff] %v4722_v21  ;;  %v695_v19 = vrot.slane %v4472_v62, 2  ;;  %v2118_v35 = vsel %vm444_vm0, %v4161_v40, 0  ;;  %v1298_v34 = vrot.slane %v4707_v55, 1  ;;  %v1946_v23 = vrot.slane %v4710_v9, 1 }
  0x3d   : > { %5739 = vst [vmem:[#allocation48_spill] sm:$0xff] %v4728_v53  ;;  %v4741_v18 = vsel %vm333_vm2, %v1295_v1, %v1296_v58  ;;  %v4744_v42 = vsel %vm333_vm2, %v1943_v49, %v1944_v7  ;;  %v1299_v14 = vrot.slane %v4722_v21, 1  ;;  %v686_v0 = vrot.slane %v4411_v32, 2  ;;  %v4764_v7 = vld [vmem:[%s5602_s1 + $0x84] sm:$0xff]  }
  0x3e   : > { %5740 = vst [vmem:[#allocation49_spill] sm:$0xff] %v4741_v18  ;;  %5741 = vst [vmem:[#allocation50_spill] sm:$0xff] %v4744_v42  ;;  %v1947_v8 = vrot.slane %v4728_v53, 1  ;;  %v689_v9 = vrot.slane %v4413_v33, 2  ;;  %v698_v1 = vrot.slane %v4482_v2, 2  ;;  %v696_v49 = vsel %vm678_vm3, %v694_v41, %v695_v19 }
  0x3f   : > { %v679_v58 = vrot.slane %v4402_v28, 2  ;;  %v683_v53 = vrot.slane %v4409_v31, 2  ;;  %v1951_v41 = vpack.c.bf16 %v4744_v42, %v4741_v18  ;;  %v4160_v19 = vld [vmem:[%s5602_s1 + $0x20] ss:$0 sps:$4 sm:$0x33]   ;;  %v4778_v2 = vsel %vm333_vm2, %v1298_v34, %v1299_v14 }
  0x40   : > { %3538 = vmatmul.mubr.msk.bf16.gmra.mrb[12].mxu1 %vm419_vm1, %v4718_v52  ;;  %3706 = vmatmul.mubr.msk.bf16.vlgmr.msra.gmra.mrb[0].mxu0 %vm419_vm1, %v4530_v43  ;;  %v697_v43 = vrot.slane %v4430_v44, 2  ;;  %v4781_v44 = vsel %vm333_vm2, %v1946_v23, %v1947_v8  ;;  %v4789_v42 = vsel %vm678_vm3, %v691_v54, %v692_v10  ;;  %v1464_v18 = vrot.slane %v4668_v59, 2 }
  0x41   : > { %3545 = vmatprep.mubr.msk.bf16.mxu1 %vm419_vm1, %v3130_v57  ;;  %3722 = vmatpush3.bf16.msra.mxu0 %v4589_v16  ;;  %v680_v57 = vrot.slane %v4404_v29, 2  ;;  %v682_v16 = vrot.slane %v4373_v15, 2  ;;  %v2088_v14 = vrot.slane %v4671_v51, 2  ;;  %v2089_v34 = vrot.slane %v4686_v45, 2 }
  0x42   : > { %3709 = vmatprep.mubr.msk.bf16.mxu0 %vm419_vm1, %v4542_v56  ;;  %4091 = vmatprep.subr.msk.bf16.mxu0 %vm444_vm0, %v4161_v40  ;;  %v699_v21 = vsel %vm678_vm3, %v697_v43, %v698_v1  ;;  %v700_v56 = vrot.slane %v4439_v47, 2  ;;  %v701_v40 = vrot.slane %v4484_v3, 2  ;;  %v5743_v43 = vrot.slane %v4384_v20, 2 }
  0x43   : > { %v4775_v55 = vpack.c.bf16 %v699_v21, %v696_v49  ;;  %v5744_v8 = vrot.slane %v4366_v12, 2  ;;  %v4805_v54 = vsel %vm678_vm3, %v682_v16, %v683_v53  ;;  %v918_v53 = vrot.slane %v4470_v61, 3  ;;  %v4835_v61 = vld [vmem:[%s5602_s1 + $0x24] sm:$0xff]  }
  0x44   : > { %v4786_v1 = vsel %vm678_vm3, %v5743_v43, %v686_v0  ;;  %v4802_v0 = vsel %vm678_vm3, %v679_v58, %v680_v57  ;;  %v4808_v10 = vsel %vm678_vm3, %v700_v56, %v701_v40  ;;  %v709_v43 = vrot.slane %v4517_v38, 2 }
  0x45   : > { %5742 = vst [vmem:[#allocation51_spill] sm:$0xff] %v4775_v55  ;;  %3724 = vmatpush3.bf16.msra.mxu0 %v2118_v35  ;;  %v1465_v35 = vrot.slane %v4684_v25, 2  ;;  %v4799_v23 = vsel %vm678_vm3, %v5744_v8, %v689_v9  ;;  %v710_v55 = vrot.slane %v4578_v37, 2  ;;  %v712_v9 = vrot.slane %v4520_v39, 2 }
  0x46   : > { %3741 = vmatprep.subr.bf16.mxu0 %v4764_v7  ;;  %v713_v58 = vrot.slane %v4580_v46, 2  ;;  %v920_v57 = vrot.slane %v4419_v36, 3  ;;  %v921_v16 = vrot.slane %v4472_v62, 3  ;;  %v789_v56 = vsel %vm444_vm0, %v4160_v19, 0 }
  0x47   : > { %v4830_v36 = vpack.c.bf16 %v696_v49, %v4789_v42  ;;  %v4841_v62 = vsel %vm678_vm3, %v2088_v14, %v2089_v34  ;;  %v4852_v49 = vpack.c.bf16 %v4808_v10, %v699_v21  ;;  %v4855_v40 = vsel %vm678_vm3, %v709_v43, %v710_v55  ;;  %v5746_v55 = vld [vmem:[#allocation42_spill] sm:$0xff]  ;;  %v5769_v34 = vld [vmem:[#allocation45_spill] sm:$0xff] }
  0x48   : > { %3546 = vmatmul.mubr.msk.bf16.vlgmr.msra.gmra.mrb[0].mxu1 %vm419_vm1, %v4369_v13  ;;  %3710 = vmatmul.mubr.msk.bf16.gmra.mrb[4].mxu0 %vm419_vm1, %v1951_v41  ;;  %v3134_v13 = vcombine.low %v4509_v27, %v4523_v5  ;;  %v1952_v27 = vpack.c.bf16 %v4781_v44, %v4778_v2  ;;  %v715_v41 = vrot.slane %v4547_v60, 2  ;;  %v912_v8 = vrot.slane %v4411_v32, 3  ;;  %v5797_v5 = vld [vmem:[#allocation23_spill] sm:$0xff] }
  0x49   : > { %3562 = vmatpush3.bf16.msra.mxu1 %v4574_v22  ;;  %3549 = vmatprep.mubr.msk.bf16.mxu1 %vm419_vm1, %v4391_v24  ;;  %v4838_v24 = vsel %vm678_vm3, %v1464_v18, %v1465_v35  ;;  %v4847_v22 = vpack.c.bf16 %v4799_v23, %v4786_v1  ;;  %v4858_v18 = vsel %vm678_vm3, %v712_v9, %v713_v58  ;;  %v915_v43 = vrot.slane %v4413_v33, 3 }
  0x4a   : > { %3713 = vmatprep.mubr.msk.bf16.mxu0 %vm419_vm1, %v4641_v17  ;;  %4083 = vmatprep.subr.msk.bf16.mxu1 %vm444_vm0, %v4160_v19  ;;  %v716_v19 = vrot.slane %v4650_v50, 2  ;;  %v4873_v9 = vpack.c.bf16 %v4858_v18, %v4855_v40  ;;  %v922_v14 = vsel %vm904_vm4, %v920_v57, %v921_v16  ;;  %v5747_v33 = vrot.slane %v4384_v20, 3 }
  0x4b   : > { %v905_v57 = vrot.slane %v4402_v28, 3  ;;  %v906_v16 = vrot.slane %v4404_v29, 3 }
  0x4c   : > { %v4887_v32 = vsel %vm678_vm3, %v715_v41, %v716_v19  ;;  %v4892_v58 = vsel %vm904_vm4, %v5747_v33, %v912_v8  ;;  %v909_v41 = vrot.slane %v4409_v31, 3  ;;  %v5749_v19 = vld [vmem:[#allocation10_spill] sm:$0xff]  ;;  %v926_v8 = vrot.slane %v4439_v47, 3 }
  0x4d   : > { %3564 = vmatpush3.bf16.msra.mxu1 %v789_v56  ;;  %v5745_v56 = vrot.slane %v4398_v26, 3  ;;  %v5748_v26 = vrot.slane %v4366_v12, 3  ;;  %v908_v12 = vrot.slane %v4373_v15, 3  ;;  %v923_v28 = vrot.slane %v5749_v19, 3 }
  0x4e   : > { %3581 = vmatprep.subr.bf16.mxu1 %v4835_v61  ;;  %v1634_v33 = vrot.slane %v4684_v25, 3  ;;  %v2233_v31 = vrot.slane %v4671_v51, 3  ;;  %v935_v51 = vrot.slane %v4517_v38, 3  ;;  %v939_v19 = vrot.slane %v4580_v46, 3 }
  0x4f   : > { %v4879_v35 = vsel %vm904_vm4, %v5745_v56, %v918_v53  ;;  %v4897_v53 = vsel %vm904_vm4, %v5748_v26, %v915_v43  ;;  %v927_v43 = vrot.slane %v4484_v3, 3  ;;  %v1633_v56 = vrot.slane %v4668_v59, 3 }
  0x50   : > { %3550 = vmatmul.mubr.msk.bf16.gmra.mrb[4].mxu1 %vm419_vm1, %v4442_v48  ;;  %3714 = vmatmul.mubr.msk.bf16.gmra.mrb[8].mxu0 %vm419_vm1, %v5746_v55  ;;  %v4905_v48 = vpack.c.bf16 %v4897_v53, %v4892_v58  ;;  %v4908_v20 = vpack.c.bf16 %v922_v14, %v4879_v35  ;;  %v5750_v55 = vld [vmem:[#allocation16_spill] sm:$0xff]  ;;  %v4923_v29 = vsel %vm904_vm4, %v908_v12, %v909_v41  ;;  %v2234_v26 = vrot.slane %v4686_v45, 3  ;;  %v4165_v12 = vld [vmem:[%s5602_s1 + $0x8c] ss:$0 sps:$4 sm:$0x33]  }
  0x51   : > { %3553 = vmatprep.mubr.msk.bf16.mxu1 %vm419_vm1, %v3134_v13  ;;  %3717 = vmatprep.mubr.msk.bf16.mxu0 %vm419_vm1, %v4718_v52  ;;  %v924_v13 = vrot.slane %v5750_v55, 3  ;;  %v4917_v52 = vsel %vm904_vm4, %v905_v57, %v906_v16  ;;  %v4931_v57 = vsel %vm904_vm4, %v926_v8, %v927_v43  ;;  %v4936_v59 = vsel %vm904_vm4, %v1633_v56, %v1634_v33  ;;  %v5753_v55 = vld [vmem:[#allocation24_spill] sm:$0xff]  ;;  %v5755_v43 = vld [vmem:[#allocation26_spill] sm:$0xff] }
  0x52   : > { %5751 = vst [vmem:[#allocation42_spill] sm:$0xff] %v4931_v57  ;;  %v4942_v16 = vsel %vm904_vm4, %v2233_v31, %v2234_v26  ;;  %v936_v45 = vrot.slane %v4578_v37, 3  ;;  %v938_v41 = vrot.slane %v4520_v39, 3  ;;  %v942_v37 = vrot.slane %v4650_v50, 3  ;;  %v5768_v26 = vld [vmem:[#allocation39_spill] sm:$0xff] }
  0x53   : > { %v925_v15 = vsel %vm904_vm4, %v923_v28, %v924_v13  ;;  %v941_v28 = vrot.slane %v4547_v60, 3  ;;  %v944_v13 = vrot.slane %v4550_v63, 3  ;;  %v945_v8 = vrot.slane %v4652_v30, 3 }
  0x54   : > { %v4933_v3 = vpack.c.bf16 %v925_v15, %v922_v14  ;;  %v4939_v25 = vpack.c.bf16 %v4931_v57, %v925_v15  ;;  %v4958_v38 = vsel %vm904_vm4, %v935_v51, %v936_v45  ;;  %v4968_v39 = vsel %vm904_vm4, %v938_v41, %v939_v19  ;;  %v5760_v15 = vld [vmem:[#allocation28_spill] sm:$0xff]  ;;  %v5000_v14 = vld [vmem:[%s4355_s23 + $0x50] sm:$0xf]  ;;  %v5780_v57 = vld [vmem:[#allocation37_spill] sm:$0xff] }
  0x55   : > { %5754 = vst [vmem:[#allocation16_spill] sm:$0xff] %v4958_v38  ;;  %5756 = vst [vmem:[#allocation24_spill] sm:$0xff] %v4968_v39  ;;  %v929_v60 = vrot.slane %v4561_v4, 3  ;;  %v930_v46 = vrot.slane %v4563_v6, 3  ;;  %v932_v50 = vrot.slane %v4566_v11, 3  ;;  %v4978_v56 = vsel %vm904_vm4, %v941_v28, %v942_v37  ;;  %v5764_v28 = vld [vmem:[#allocation32_spill] sm:$0xff] }
  0x56   : > { %5752 = vst [vmem:[#allocation10_spill] sm:$0xff] %v4933_v3  ;;  %5758 = vst [vmem:[#allocation52_spill] sm:$0xff] %v4978_v56  ;;  %v4981_v33 = vsel %vm904_vm4, %v944_v13, %v945_v8  ;;  %v933_v31 = vrot.slane %v5760_v15, 3  ;;  %v2263_v51 = vsel %vm444_vm0, %v4165_v12, 0  ;;  %v5765_v37 = vld [vmem:[#allocation38_spill] sm:$0xff]  ;;  %v5766_v8 = vld [vmem:[#allocation33_spill] sm:$0xff] }
  0x57   : > { %5759 = vst [vmem:[#allocation53_spill] sm:$0xff] %v4981_v33  ;;  %v4988_v45 = vpack.c.bf16 %v4981_v33, %v4978_v56  ;;  %v4991_v41 = vsel %vm904_vm4, %v929_v60, %v930_v46  ;;  %v948_v13 = vrot.slane %v5765_v37, 3  ;;  %5767 = vst [vmem:[#allocation32_spill] sm:$0xff] %v5000_v14  ;;  %v951_v21 = vrot.slane %v5768_v26, 3  ;;  %v5770_v46 = vld [vmem:[#allocation47_spill] sm:$0xff]  ;;  %v5773_v56 = vld [vmem:[#allocation9_spill] sm:$0xff] }
  0x58   : > { %3554 = vmatmul.mubr.msk.bf16.gmra.mrb[8].mxu1 %vm419_vm1, %v5753_v55  ;;  %3718 = vmatmul.mubr.msk.bf16.gmra.mrb[12].mxu0 %vm419_vm1, %v1952_v27  ;;  %v4975_v27 = vpack.c.bf16 %v4968_v39, %v4958_v38  ;;  %5762 = vst [vmem:[#allocation54_spill] sm:$0xff] %v4991_v41  ;;  %v4994_v19 = vsel %vm904_vm4, %v932_v50, %v933_v31  ;;  %v947_v55 = vrot.slane %v5764_v28, 3  ;;  %v1636_v60 = vrot.slane %v5769_v34, 3  ;;  %v5771_v31 = vld [vmem:[#allocation46_spill] sm:$0xff]  ;;  %v5772_v38 = vld [vmem:[#allocation48_spill] sm:$0xff] }
  0x59   : > { %3557 = vmatprep.mubr.msk.bf16.mxu1 %vm419_vm1, %v5755_v43  ;;  %3725 = vmatprep.mubr.msk.bf16.mxu0 %vm419_vm1, %v4847_v22  ;;  %5761 = vst [vmem:[#allocation28_spill] sm:$0xff] %v4988_v45  ;;  %5763 = vst [vmem:[#allocation55_spill] sm:$0xff] %v4994_v19  ;;  %v950_v43 = vrot.slane %v5766_v8, 3  ;;  %v1637_v17 = vrot.slane %v5770_v46, 3  ;;  %v2236_v3 = vrot.slane %v5771_v31, 3  ;;  %v2237_v33 = vrot.slane %v5772_v38, 3 }
  0x5a   : > { %5757 = vst [vmem:[#allocation26_spill] sm:$0xff] %v4975_v27  ;;  %v5008_v50 = vsel %vm904_vm4, %v947_v55, %v948_v13  ;;  %v5774_v39 = vld [vmem:[#allocation8_spill] sm:$0xff]  ;;  %v5023_v19 = vunpack.c.l.bf16 %v5000_v14  ;;  %v5028_v27 = vld [vmem:[%s4355_s23 + $0xa8] sm:$0xf]  ;;  %v223_v13 = vld [vmem:[%s4355_s23 + $0x54] sm:$0x3] }
  0x5b   : > { %v5014_v45 = vcombine.low %v5774_v39, %v5773_v56  ;;  %v5017_v47 = vsel %vm904_vm4, %v950_v43, %v951_v21  ;;  %v5020_v41 = vsel %vm904_vm4, %v1636_v60, %v1637_v17  ;;  %5779 = vst [vmem:[#allocation45_spill] sm:$0xff] %v5028_v27  ;;  %v721_v21 = vrot.slane %v5764_v28, 2  ;;  %v5782_v56 = vld [vmem:[#allocation19_spill] sm:$0xff]  ;;  %v5783_v43 = vld [vmem:[#allocation18_spill] sm:$0xff]  ;;  %v5795_v14 = vld [vmem:[#allocation21_spill] sm:$0xff] }
  0x5c   : > { %5776 = vst [vmem:[#allocation33_spill] sm:$0xff] %v5017_v47  ;;  %5777 = vst [vmem:[#allocation39_spill] sm:$0xff] %v5020_v41  ;;  %v5037_v17 = vpack.c.bf16 %v5017_v47, %v5008_v50  ;;  %v5040_v39 = vsel %vm904_vm4, %v2236_v3, %v2237_v33  ;;  %v5044_v60 = vcombine.low %v5783_v43, %v5782_v56  ;;  %v722_v28 = vrot.slane %v5765_v37, 2  ;;  %v5786_v3 = vld [vmem:[#allocation27_spill] sm:$0xff]  ;;  %v5787_v33 = vld [vmem:[#allocation20_spill] sm:$0xff] }
  0x5d   : > { %5775 = vst [vmem:[#allocation38_spill] sm:$0xff] %v5014_v45  ;;  %5781 = vst [vmem:[#allocation47_spill] sm:$0xff] %v5040_v39  ;;  %v5057_v55 = vcombine.low %v5787_v33, %v5786_v3  ;;  %v5791_v37 = vld [vmem:[#allocation29_spill] sm:$0xff]  ;;  %v5794_v56 = vld [vmem:[#allocation15_spill] sm:$0xff]  ;;  %v5087_v47 = vunpack.c.l.bf16 %v223_v13  ;;  %v724_v39 = vrot.slane %v5766_v8, 2  ;;  %v725_v33 = vrot.slane %v5768_v26, 2 }
  0x5e   : > { %5784 = vst [vmem:[#allocation46_spill] sm:$0xff] %v5044_v60  ;;  %v5080_v45 = vpack.c.bf16 %v5795_v14, %v5794_v56  ;;  %v5803_v14 = vld [vmem:[#allocation43_spill] sm:$0xff]  ;;  %v5806_v13 = vld [vmem:[#allocation44_spill] sm:$0xff]  ;;  %v4164_v26 = vld [vmem:[%s5602_s1 + $0x2c] ss:$0 sps:$4 sm:$0x33]  }
  0x5f   : > { %5788 = vst [vmem:[#allocation48_spill] sm:$0xff] %v5057_v55  ;;  %v5798_v55 = vld [vmem:[#allocation49_spill] sm:$0xff]  ;;  %v5805_v3 = vld [vmem:[#allocation35_spill] sm:$0xff] }
  0x60   : > { %3558 = vmatmul.mubr.msk.bf16.gmra.mrb[12].mxu1 %vm419_vm1, %v5780_v57  ;;  %3726 = vmatmul.mubr.msk.bf16.vlgmr.msra.gmra.mrb[0].mxu0 %vm419_vm1, %v4830_v36  ;;  %v5785_v57 = vpack.c.bf16 %v4805_v54, %v4802_v0  ;;  %v5790_v0 = vld [vmem:[#allocation30_spill] sm:$0xff]  ;;  %5796 = vst [vmem:[#allocation8_spill] sm:$0xff] %v5080_v45  ;;  %v5085_v60 = vpack.c.bf16 %v5798_v55, %v5797_v5  ;;  %v2520_v55 = vrot.slane %v5087_v47, 1  ;;  %v5810_v5 = vrot.slane %v4563_v6, 2 }
  0x61   : > { %3742 = vmatpush3.bf16.msra.mxu0 %v4764_v7  ;;  %3729 = vmatprep.mubr.msk.bf16.mxu0 %vm419_vm1, %v4852_v49  ;;  %v5067_v7 = vld [vmem:[%s5602_s1 + $0x90] sm:$0xff]   ;;  %v5071_v43 = vcombine.low %v5791_v37, %v5790_v0  ;;  %v2519_v0 = vrot.slane %v5023_v19, 1  ;;  %v5800_v37 = vld [vmem:[#allocation36_spill] sm:$0xff] }
  0x62   : > { %3565 = vmatprep.mubr.msk.bf16.mxu1 %vm419_vm1, %v5785_v57  ;;  %4092 = vmatprep.subr.msk.bf16.mxu0 %vm444_vm0, %v4165_v12  ;;  %v5074_v57 = vunpack.c.l.bf16 %v5028_v27  ;;  %v245_v12 = vld [vmem:[%s4355_s23 + $0xac] sm:$0x3]  ;;  %5799 = vst [vmem:[#allocation37_spill] sm:$0xff] %v5085_v60  ;;  %v5802_v27 = vld [vmem:[#allocation41_spill] sm:$0xff]  ;;  %v5105_v60 = vpack.c.bf16 %v4778_v2, %v5806_v13  ;;  %v2664_v2 = vrot.slane %v5023_v19, 2 }
  0x63   : > { %5792 = vst [vmem:[#allocation9_spill] sm:$0xff] %v5071_v43  ;;  %v5801_v43 = vld [vmem:[#allocation40_spill] sm:$0xff]  ;;  %v5098_v56 = vpack.c.bf16 %v5803_v14, %v5802_v27  ;;  %v5804_v45 = vld [vmem:[#allocation34_spill] sm:$0xff]  ;;  %v5116_v27 = vpack.c.bf16 %v4789_v42, %v4799_v23  ;;  %v5809_v14 = vrot.slane %v4550_v63, 2  ;;  %v5133_v23 = vsel %vm333_vm2, %v2519_v0, %v2520_v55 }
  0x64   : > { %v5092_v41 = vpack.c.bf16 %v5801_v43, %v5800_v37  ;;  %5807 = vst [vmem:[#allocation19_spill] sm:$0xff] %v5105_v60  ;;  %v5107_v43 = vunpack.c.l.bf16 %v245_v12  ;;  %v2522_v8 = vrot.slane %v5074_v57, 1  ;;  %v2665_v12 = vrot.slane %v5087_v47, 2  ;;  %v5813_v63 = vld [vmem:[#allocation50_spill] sm:$0xff] }
  0x65   : > { %3744 = vmatpush3.bf16.msra.mxu0 %v2263_v51  ;;  %v5808_v37 = vrot.slane %v4652_v30, 2  ;;  %v5811_v60 = vrot.slane %v4561_v4, 2  ;;  %v5812_v30 = vpack.c.bf16 %v4841_v62, %v4838_v24  ;;  %v2527_v6 = vpack.c.bf16 %v5133_v23, %v5813_v63 }
  0x66   : > { %3761 = vmatprep.subr.bf16.mxu0 %v5067_v7  ;;  %v2523_v51 = vrot.slane %v5107_v43, 1  ;;  %v5146_v4 = vpack.c.bf16 %v4838_v24, %v4808_v10  ;;  %v5815_v0 = vrot.slane %v4566_v11, 2  ;;  %v726_v11 = vsel %vm678_vm3, %v724_v39, %v725_v33  ;;  %v4166_v24 = vld [vmem:[%s5602_s1 + $0x30] sm:$0xff]  }
  0x67   : > { %v720_v13 = vsel %vm678_vm3, %v5809_v14, %v5808_v37  ;;  %v705_v42 = vsel %vm678_vm3, %v5811_v60, %v5810_v5  ;;  %v5149_v60 = vsel %vm678_vm3, %v2664_v2, %v2665_v12  ;;  %v1467_v2 = vrot.slane %v5769_v34, 2 }
  0x68   : > { %3566 = vmatmul.mubr.msk.bf16.vlgmr.msra.gmra.mrb[0].mxu1 %vm419_vm1, %v4847_v22  ;;  %3730 = vmatmul.mubr.msk.bf16.gmra.mrb[4].mxu0 %vm419_vm1, %v5812_v30  ;;  %v5814_v22 = vrot.slane %v5760_v15, 2  ;;  %v5162_v55 = vsel %vm333_vm2, %v2522_v8, %v2523_v51  ;;  %v2672_v10 = vpack.c.bf16 %v5149_v60, %v4841_v62  ;;  %v749_v8 = vpack.c.bf16 %v720_v13, %v4887_v32 }
  0x69   : > { %3582 = vmatpush3.bf16.msra.mxu1 %v4835_v61  ;;  %3569 = vmatprep.mubr.msk.bf16.mxu1 %vm419_vm1, %v4830_v36  ;;  %v1015_v36 = vsel %vm444_vm0, %v4164_v26, 0  ;;  %v723_v61 = vsel %vm678_vm3, %v721_v21, %v722_v28  ;;  %v2528_v15 = vpack.c.bf16 %v5162_v55, %v4781_v44  ;;  %v2091_v21 = vrot.slane %v5771_v31, 2 }
  0x6a   : > { %v5159_v5 = vsel %vm678_vm3, %v5815_v0, %v5814_v22  ;;  %3733 = vmatprep.mubr.msk.bf16.mxu0 %vm419_vm1, %v4873_v9  ;;  %4084 = vmatprep.subr.msk.bf16.mxu1 %vm444_vm0, %v4164_v26  ;;  %v750_v12 = vpack.c.bf16 %v726_v11, %v723_v61  ;;  %v1468_v26 = vrot.slane %v5770_v46, 2  ;;  %v2092_v39 = vrot.slane %v5772_v38, 2 }
  0x6b   : > { %v747_v51 = vpack.c.bf16 %v5159_v5, %v705_v42  ;;  %v5188_v28 = vpack.c.bf16 %v4887_v32, %v4858_v18  ;;  %v5190_v33 = vpack.c.bf16 %v723_v61, %v720_v13  ;;  %v1476_v34 = vpack.c.bf16 %v4855_v40, %v5159_v5  ;;  %v4169_v13 = vld [vmem:[%s5602_s1 + $0x98] ss:$0 sps:$4 sm:$0x33]  }
  0x6c   : > { %v1469_v38 = vsel %vm678_vm3, %v1467_v2, %v1468_v26  ;;  %v5198_v46 = vsel %vm678_vm3, %v2091_v21, %v2092_v39  ;;  %v2667_v31 = vrot.slane %v5074_v57, 2  ;;  %v2668_v18 = vrot.slane %v5107_v43, 2  ;;  %v5823_v2 = vld [vmem:[#allocation53_spill] sm:$0xff]  ;;  %v5824_v26 = vld [vmem:[#allocation55_spill] sm:$0xff]  ;;  %v5825_v21 = vld [vmem:[#allocation16_spill] sm:$0xff] }
  0x6d   : > { %3584 = vmatpush3.bf16.msra.mxu1 %v1015_v36  ;;  %v5206_v32 = vpack.c.bf16 %v1469_v38, %v726_v11  ;;  %v1641_v42 = vpack.c.bf16 %v4892_v58, %v4923_v29  ;;  %v5816_v30 = vpack.c.bf16 %v4923_v29, %v4917_v52  ;;  %v2400_v22 = vsel %vm444_vm0, %v4169_v13, 0  ;;  %v5818_v36 = vld [vmem:[#allocation42_spill] sm:$0xff]  ;;  %v5857_v63 = vld [vmem:[#allocation19_spill] sm:$0xff] }
  0x6e   : > { %3601 = vmatprep.subr.bf16.mxu1 %v4166_v24  ;;  %v5209_v37 = vsel %vm678_vm3, %v2667_v31, %v2668_v18  ;;  %v2809_v52 = vrot.slane %v5023_v19, 3  ;;  %v5817_v0 = vpack.c.bf16 %v4942_v16, %v4936_v59  ;;  %v5253_v61 = vpack.c.bf16 %v4936_v59, %v5818_v36  ;;  %v4170_v59 = vld [vmem:[%s5602_s1 + $0x3c] sm:$0xff]   ;;  %v5829_v18 = vld [vmem:[#allocation39_spill] sm:$0xff]  ;;  %v5835_v36 = vld [vmem:[#allocation6_spill] sm:$0xff] }
  0x6f   : > { %v2673_v14 = vpack.c.bf16 %v5209_v37, %v5198_v46  ;;  %v1645_v39 = vpack.c.bf16 %v5825_v21, %v5824_v26  ;;  %v2813_v31 = vrot.slane %v5107_v43, 3  ;;  %v5856_v23 = vpack.c.bf16 %v5805_v3, %v5804_v45  ;;  %v4188_v45 = vld [vmem:[%s5602_s1 + $0xbc] ss:$0 sps:$4 sm:$0x33]   ;;  %v5858_v3 = vld [vmem:[#allocation51_spill] sm:$0xff] }
  0x70   : > { %3570 = vmatmul.mubr.msk.bf16.gmra.mrb[4].mxu1 %vm419_vm1, %v4852_v49  ;;  %3734 = vmatmul.mubr.msk.bf16.gmra.mrb[8].mxu0 %vm419_vm1, %v749_v8  ;;  %v2097_v49 = vpack.c.bf16 %v5198_v46, %v1469_v38  ;;  %v5826_v38 = vld [vmem:[#allocation54_spill] sm:$0xff]  ;;  %v5859_v44 = vpack.c.bf16 %v4786_v1, %v4805_v54 }
  0x71   : > { %3573 = vmatprep.mubr.msk.bf16.mxu1 %vm419_vm1, %v747_v51  ;;  %3737 = vmatprep.mubr.msk.bf16.mxu0 %vm419_vm1, %v750_v12  ;;  %v5860_v54 = vld [vmem:[#allocation10_spill] sm:$0xff] }
  0x78   : > { %3574 = vmatmul.mubr.msk.bf16.gmra.mrb[8].mxu1 %vm419_vm1, %v4873_v9  ;;  %3738 = vmatmul.mubr.msk.bf16.gmra.mrb[12].mxu0 %vm419_vm1, %v2097_v49  ;;  %v5224_v9 = vpack.c.bf16 %v4879_v35, %v4897_v53  ;;  %v4171_v35 = vld [vmem:[%s5602_s1 + $0x9c] sm:$0xff]   ;;  %v4168_v53 = vld [vmem:[%s5602_s1 + $0x38] ss:$0 sps:$4 sm:$0x33]   ;;  %v5827_v49 = vpack.c.bf16 %v5824_v26, %v5826_v38  ;;  %v5841_v38 = vld [vmem:[#allocation46_spill] sm:$0xff] }
  0x79   : > { %3577 = vmatprep.mubr.msk.bf16.mxu1 %vm419_vm1, %v749_v8  ;;  %3745 = vmatprep.mubr.msk.bf16.mxu0 %vm419_vm1, %v4905_v48  ;;  %v1176_v19 = vsel %vm444_vm0, %v4168_v53, 0  ;;  %v5822_v8 = vld [vmem:[#allocation52_spill] sm:$0xff] }
  0x80   : > { %3578 = vmatmul.mubr.msk.bf16.gmra.mrb[12].mxu1 %vm419_vm1, %v750_v12  ;;  %3746 = vmatmul.mubr.msk.bf16.vlgmr.msra.gmra.mrb[0].mxu0 %vm419_vm1, %v4908_v20  ;;  %v5279_v12 = vpack.c.bf16 %v5008_v50, %v5823_v2  ;;  %v5828_v50 = vld [vmem:[#allocation47_spill] sm:$0xff] }
  0x81   : > { %3585 = vmatprep.mubr.msk.bf16.mxu1 %vm419_vm1, %v5816_v30  ;;  %3762 = vmatpush3.bf16.msra.mxu0 %v5067_v7  ;;  %v2810_v7 = vrot.slane %v5087_v47, 3  ;;  %v5831_v30 = vld [vmem:[#allocation33_spill] sm:$0xff] }
  0x82   : > { %3749 = vmatprep.mubr.msk.bf16.mxu0 %vm419_vm1, %v4939_v25  ;;  %4093 = vmatprep.subr.msk.bf16.mxu0 %vm444_vm0, %v4169_v13  ;;  %v5830_v13 = vpack.c.bf16 %v5828_v50, %v5829_v18 }
  0x83   : > { %v5256_v11 = vsel %vm904_vm4, %v2809_v52, %v2810_v7  ;;  %v4178_v52 = vld [vmem:[%s5602_s1 + $0xa4] ss:$0 sps:$4 sm:$0x33]   ;;  %v5833_v7 = vld [vmem:[#allocation12_spill] sm:$0xff] }
  0x84   : > { %v2817_v47 = vpack.c.bf16 %v5256_v11, %v4942_v16 }
  0x85   : > { %3764 = vmatpush3.bf16.msra.mxu0 %v2400_v22  ;;  %v5299_v22 = vpack.c.bf16 %v5829_v18, %v5831_v30  ;;  %v5844_v18 = vld [vmem:[#allocation17_spill] sm:$0xff] }
  0x86   : > { %3781 = vmatprep.subr.bf16.mxu0 %v4171_v35  ;;  %v5846_v30 = vld [vmem:[#allocation9_spill] sm:$0xff] }
  0x88   : > { %3586 = vmatmul.mubr.msk.bf16.vlgmr.msra.gmra.mrb[0].mxu1 %vm419_vm1, %v4905_v48  ;;  %3750 = vmatmul.mubr.msk.bf16.gmra.mrb[4].mxu0 %vm419_vm1, %v5817_v0  ;;  %v5819_v48 = vld [vmem:[#allocation26_spill] sm:$0xff]  ;;  %v5834_v0 = vld [vmem:[#allocation5_spill] sm:$0xff] }
  0x89   : > { %3602 = vmatpush3.bf16.msra.mxu1 %v4166_v24  ;;  %3589 = vmatprep.mubr.msk.bf16.mxu1 %vm419_vm1, %v4908_v20  ;;  %v5820_v20 = vld [vmem:[#allocation28_spill] sm:$0xff] }
  0x8a   : > { %3753 = vmatprep.mubr.msk.bf16.mxu0 %vm419_vm1, %v5819_v48  ;;  %4085 = vmatprep.subr.msk.bf16.mxu1 %vm444_vm0, %v4168_v53  ;;  %v5821_v24 = vld [vmem:[#allocation24_spill] sm:$0xff] }
  0x8b   : > { %v5275_v51 = vpack.c.bf16 %v5822_v8, %v5821_v24  ;;  %v4177_v24 = vld [vmem:[%s5602_s1 + $0x44] ss:$0 sps:$4 sm:$0x33]   ;;  %v5839_v8 = vld [vmem:[#allocation32_spill] sm:$0xff] }
  0x8d   : > { %3604 = vmatpush3.bf16.msra.mxu1 %v1176_v19  ;;  %v5837_v19 = vld [vmem:[#allocation38_spill] sm:$0xff] }
  0x8e   : > { %3621 = vmatprep.subr.bf16.mxu1 %v4170_v59 }
  0x90   : > { %3590 = vmatmul.mubr.msk.bf16.gmra.mrb[4].mxu1 %vm419_vm1, %v4939_v25  ;;  %3754 = vmatmul.mubr.msk.bf16.gmra.mrb[8].mxu0 %vm419_vm1, %v5820_v20  ;;  %v2812_v25 = vrot.slane %v5074_v57, 3  ;;  %v5832_v57 = vld [vmem:[#allocation7_spill] sm:$0xff] }
  0x91   : > { %3593 = vmatprep.mubr.msk.bf16.mxu1 %vm419_vm1, %v5827_v49  ;;  %3757 = vmatprep.mubr.msk.bf16.mxu0 %vm419_vm1, %v5037_v17  ;;  %v1349_v49 = vsel %vm444_vm0, %v4177_v24, 0 }
  0x92   : > { %v5302_v53 = vsel %vm904_vm4, %v2812_v25, %v2813_v31  ;;  %v4181_v25 = vld [vmem:[%s5602_s1 + $0x48] sm:$0xff]  }
  0x93   : > { %v2818_v43 = vpack.c.bf16 %v5302_v53, %v5828_v50  ;;  %v5843_v31 = vld [vmem:[#allocation22_spill] sm:$0xff] }
  0x98   : > { %3594 = vmatmul.mubr.msk.bf16.gmra.mrb[8].mxu1 %vm419_vm1, %v5819_v48  ;;  %3758 = vmatmul.mubr.msk.bf16.gmra.mrb[12].mxu0 %vm419_vm1, %v5830_v13  ;;  %v5836_v48 = vcombine.low %v5834_v0, %v5835_v36  ;;  %v5845_v13 = vcombine.low %v5843_v31, %v5844_v18  ;;  %v5850_v0 = vld [vmem:[#allocation8_spill] sm:$0xff]  ;;  %v4184_v36 = vld [vmem:[%s5602_s1 + $0xb0] ss:$0 sps:$4 sm:$0x33]  }
  0x99   : > { %3597 = vmatprep.mubr.msk.bf16.mxu1 %vm419_vm1, %v5820_v20  ;;  %3765 = vmatprep.mubr.msk.bf16.mxu0 %vm419_vm1, %v5832_v57  ;;  %v2549_v20 = vsel %vm444_vm0, %v4178_v52, 0 }
  0xa0   : > { %3598 = vmatmul.mubr.msk.bf16.gmra.mrb[12].mxu1 %vm419_vm1, %v5037_v17  ;;  %3766 = vmatmul.mubr.msk.bf16.vlgmr.msra.gmra.mrb[0].mxu0 %vm419_vm1, %v5833_v7  ;;  %v4182_v17 = vld [vmem:[%s5602_s1 + $0xa8] sm:$0xff]  }
  0xa1   : > { %3605 = vmatprep.mubr.msk.bf16.mxu1 %vm419_vm1, %v5836_v48  ;;  %3782 = vmatpush3.bf16.msra.mxu0 %v4171_v35  ;;  %v5838_v35 = vld [vmem:[#allocation11_spill] sm:$0xff]  ;;  %v5851_v48 = vld [vmem:[#allocation25_spill] sm:$0xff] }
  0xa2   : > { %3769 = vmatprep.mubr.msk.bf16.mxu0 %vm419_vm1, %v5837_v19  ;;  %4094 = vmatprep.subr.msk.bf16.mxu0 %vm444_vm0, %v4178_v52  ;;  %v5840_v2 = vcombine.low %v5838_v35, %v5839_v8  ;;  %v5848_v52 = vld [vmem:[#allocation45_spill] sm:$0xff]  ;;  %v2694_v8 = vsel %vm444_vm0, %v4184_v36, 0 }
  0xa3   : > { %v5855_v35 = vld [vmem:[#allocation37_spill] sm:$0xff] }
  0xa5   : > { %3784 = vmatpush3.bf16.msra.mxu0 %v2549_v20  ;;  %v5853_v20 = vld [vmem:[#allocation13_spill] sm:$0xff] }
  0xa6   : > { %3801 = vmatprep.subr.bf16.mxu0 %v4182_v17 }
  0xa8   : > { %3606 = vmatmul.mubr.msk.bf16.vlgmr.msra.gmra.mrb[0].mxu1 %vm419_vm1, %v5832_v57  ;;  %3770 = vmatmul.mubr.msk.bf16.gmra.mrb[4].mxu0 %vm419_vm1, %v5840_v2  ;;  %v5847_v57 = vld [vmem:[#allocation31_spill] sm:$0xff] }
  0xa9   : > { %3622 = vmatpush3.bf16.msra.mxu1 %v4170_v59  ;;  %3609 = vmatprep.mubr.msk.bf16.mxu1 %vm419_vm1, %v5833_v7  ;;  %v5842_v59 = vld [vmem:[#allocation48_spill] sm:$0xff]  ;;  %v5849_v7 = vcombine.low %v5847_v57, %v5848_v52  ;;  %v4186_v2 = vld [vmem:[%s5602_s1 + $0xb4] sm:$0xff]  }
  0xaa   : > { %3773 = vmatprep.mubr.msk.bf16.mxu0 %vm419_vm1, %v5841_v38  ;;  %4086 = vmatprep.subr.msk.bf16.mxu1 %vm444_vm0, %v4177_v24 }
  0xad   : > { %3624 = vmatpush3.bf16.msra.mxu1 %v1349_v49  ;;  %v4185_v49 = vld [vmem:[%s5602_s1 + $0x54] sm:$0xff]  }
  0xae   : > { %3641 = vmatprep.subr.bf16.mxu1 %v4181_v25 }
  0xb0   : > { %3610 = vmatmul.mubr.msk.bf16.gmra.mrb[4].mxu1 %vm419_vm1, %v5837_v19  ;;  %3774 = vmatmul.mubr.msk.bf16.gmra.mrb[8].mxu0 %vm419_vm1, %v5842_v59  ;;  %v5852_v19 = vld [vmem:[#allocation14_spill] sm:$0xff] }
  0xb1   : > { %3613 = vmatprep.mubr.msk.bf16.mxu1 %vm419_vm1, %v5845_v13  ;;  %3777 = vmatprep.mubr.msk.bf16.mxu0 %vm419_vm1, %v5846_v30  ;;  %v5854_v24 = vpack.c.bf16 %v5852_v19, %v5853_v20 }
  0xb8   : > { %3614 = vmatmul.mubr.msk.bf16.gmra.mrb[8].mxu1 %vm419_vm1, %v5841_v38  ;;  %3778 = vmatmul.mubr.msk.bf16.gmra.mrb[12].mxu0 %vm419_vm1, %v5849_v7  ;;  %v4183_v38 = vld [vmem:[%s5602_s1 + $0x50] ss:$0 sps:$4 sm:$0x33]  }
  0xb9   : > { %3617 = vmatprep.mubr.msk.bf16.mxu1 %vm419_vm1, %v5842_v59  ;;  %3785 = vmatprep.mubr.msk.bf16.mxu0 %vm419_vm1, %v5850_v0 }
  0xc0   : > { %3618 = vmatmul.mubr.msk.bf16.gmra.mrb[12].mxu1 %vm419_vm1, %v5846_v30  ;;  %3786 = vmatmul.mubr.msk.bf16.vlgmr.msra.gmra.mrb[0].mxu0 %vm419_vm1, %v5851_v48 }
  0xc1   : > { %3625 = vmatprep.mubr.msk.bf16.mxu1 %vm419_vm1, %v5854_v24  ;;  %3802 = vmatpush3.bf16.msra.mxu0 %v4182_v17  ;;  %v1518_v17 = vsel %vm444_vm0, %v4183_v38, 0 }
  0xc2   : > { %3789 = vmatprep.mubr.msk.bf16.mxu0 %vm419_vm1, %v5855_v35  ;;  %4095 = vmatprep.subr.msk.bf16.mxu0 %vm444_vm0, %v4184_v36 }
  0xc5   : > { %3804 = vmatpush3.bf16.msra.mxu0 %v2694_v8 }
  0xc6   : > { %3821 = vmatprep.subr.bf16.mxu0 %v4186_v2 }
  0xc8   : > { %3626 = vmatmul.mubr.msk.bf16.vlgmr.msra.gmra.mrb[0].mxu1 %vm419_vm1, %v5850_v0  ;;  %3790 = vmatmul.mubr.msk.bf16.gmra.mrb[4].mxu0 %vm419_vm1, %v2527_v6 }
  0xc9   : > { %3642 = vmatpush3.bf16.msra.mxu1 %v4181_v25  ;;  %3629 = vmatprep.mubr.msk.bf16.mxu1 %vm419_vm1, %v5851_v48 }
  0xca   : > { %3793 = vmatprep.mubr.msk.bf16.mxu0 %vm419_vm1, %v5092_v41  ;;  %4087 = vmatprep.subr.msk.bf16.mxu1 %vm444_vm0, %v4183_v38 }
  0xcd   : > { %3644 = vmatpush3.bf16.msra.mxu1 %v1518_v17 }
  0xce   : > { %3661 = vmatprep.subr.bf16.mxu1 %v4185_v49 }
  0xd0   : > { %3630 = vmatmul.mubr.msk.bf16.gmra.mrb[4].mxu1 %vm419_vm1, %v5855_v35  ;;  %3794 = vmatmul.mubr.msk.bf16.gmra.mrb[8].mxu0 %vm419_vm1, %v5098_v56 }
  0xd1   : > { %3633 = vmatprep.mubr.msk.bf16.mxu1 %vm419_vm1, %v5856_v23  ;;  %3797 = vmatprep.mubr.msk.bf16.mxu0 %vm419_vm1, %v5857_v63 }
  0xd8   : > { %3634 = vmatmul.mubr.msk.bf16.gmra.mrb[8].mxu1 %vm419_vm1, %v5092_v41  ;;  %3798 = vmatmul.mubr.msk.bf16.gmra.mrb[12].mxu0 %vm419_vm1, %v2528_v15  ;;  %v2839_v41 = vsel %vm444_vm0, %v4188_v45, 0 }
  0xd9   : > { %3637 = vmatprep.mubr.msk.bf16.mxu1 %vm419_vm1, %v5098_v56  ;;  %3805 = vmatprep.mubr.msk.bf16.mxu0 %vm419_vm1, %v5116_v27  ;;  %v4187_v56 = vld [vmem:[%s5602_s1 + $0x5c] ss:$0 sps:$4 sm:$0x33]  }
  0xda   : > { %v1687_v1 = vsel %vm444_vm0, %v4187_v56, 0 }
  0xe0   : > { %3638 = vmatmul.mubr.msk.bf16.gmra.mrb[12].mxu1 %vm419_vm1, %v5857_v63  ;;  %3806 = vmatmul.mubr.msk.bf16.vlgmr.msra.gmra.mrb[0].mxu0 %vm419_vm1, %v5858_v3 }
  0xe1   : > { %3645 = vmatprep.mubr.msk.bf16.mxu1 %vm419_vm1, %v5859_v44  ;;  %3822 = vmatpush3.bf16.msra.mxu0 %v4186_v2 }
  0xe2   : > { %3809 = vmatprep.mubr.msk.bf16.mxu0 %vm419_vm1, %v5146_v4  ;;  %4096 = vmatprep.subr.msk.bf16.mxu0 %vm444_vm0, %v4188_v45 }
  0xe5   : > { %3824 = vmatpush3.bf16.msra.mxu0 %v2839_v41 }
  0xe8   : > { %3646 = vmatmul.mubr.msk.bf16.vlgmr.msra.gmra.mrb[0].mxu1 %vm419_vm1, %v5116_v27  ;;  %3810 = vmatmul.mubr.msk.bf16.gmra.mrb[4].mxu0 %vm419_vm1, %v2672_v10  ;;  %v5515_v27 = vld [vmem:[%s5603_s2] ss:$0 sm:$0xff] }
  0xe9   : > { %3662 = vmatpush3.bf16.msra.mxu1 %v4185_v49  ;;  %3649 = vmatprep.mubr.msk.bf16.mxu1 %vm419_vm1, %v5858_v3 }
  0xea   : > { %3813 = vmatprep.mubr.msk.bf16.mxu0 %vm419_vm1, %v5188_v28  ;;  %4088 = vmatprep.subr.msk.bf16.mxu1 %vm444_vm0, %v4187_v56 }
  0xed   : > { %3664 = vmatpush3.bf16.msra.mxu1 %v1687_v1 }
  0xf0   : > { %3650 = vmatmul.mubr.msk.bf16.gmra.mrb[4].mxu1 %vm419_vm1, %v5146_v4  ;;  %3814 = vmatmul.mubr.msk.bf16.gmra.mrb[8].mxu0 %vm419_vm1, %v5190_v33 }
  0xf1   : > { %3653 = vmatprep.mubr.msk.bf16.mxu1 %vm419_vm1, %v1476_v34  ;;  %3817 = vmatprep.mubr.msk.bf16.mxu0 %vm419_vm1, %v5206_v32 }
  0xf8   : > { %3654 = vmatmul.mubr.msk.bf16.gmra.mrb[8].mxu1 %vm419_vm1, %v5188_v28  ;;  %3818 = vmatmul.mubr.msk.bf16.gmra.mrb[12].mxu0 %vm419_vm1, %v2673_v14 }
  0xf9   : > { %3657 = vmatprep.mubr.msk.bf16.mxu1 %vm419_vm1, %v5190_v33  ;;  %3825 = vmatprep.mubr.msk.bf16.mxu0 %vm419_vm1, %v5224_v9  ;;  %v5521_v33 = vld [vmem:[%s5604_s3] ss:$0 sm:$0xff] }
 0x100   : > { %3658 = vmatmul.mubr.msk.bf16.gmra.mrb[12].mxu1 %vm419_vm1, %v5206_v32  ;;  %3826 = vmatmul.mubr.msk.bf16.vlgmr.msra.gmra.mrb[0].mxu0 %vm419_vm1, %v5860_v54 }
 0x101   : > { %3665 = vmatprep.mubr.msk.bf16.mxu1 %vm419_vm1, %v1641_v42  ;;  %3829 = vmatprep.mubr.msk.bf16.mxu0 %vm419_vm1, %v5253_v61 }
 0x108   : > { %3666 = vmatmul.mubr.msk.bf16.vlgmr.msra.gmra.mrb[0].mxu1 %vm419_vm1, %v5224_v9  ;;  %3830 = vmatmul.mubr.msk.bf16.gmra.mrb[4].mxu0 %vm419_vm1, %v2817_v47 }
 0x109   : > { %3669 = vmatprep.mubr.msk.bf16.mxu1 %vm419_vm1, %v5860_v54  ;;  %3833 = vmatprep.mubr.msk.bf16.mxu0 %vm419_vm1, %v5275_v51 }
 0x110   : > { %3670 = vmatmul.mubr.msk.bf16.gmra.mrb[4].mxu1 %vm419_vm1, %v5253_v61  ;;  %3834 = vmatmul.mubr.msk.bf16.gmra.mrb[8].mxu0 %vm419_vm1, %v5279_v12 }
 0x111   : > { %3673 = vmatprep.mubr.msk.bf16.mxu1 %vm419_vm1, %v1645_v39  ;;  %3837 = vmatprep.mubr.msk.bf16.mxu0 %vm419_vm1, %v5299_v22 }
 0x118   : > { %3674 = vmatmul.mubr.msk.bf16.gmra.mrb[8].mxu1 %vm419_vm1, %v5275_v51  ;;  %3838 = vmatmul.mubr.msk.bf16.gmra.mrb[12].mxu0 %vm419_vm1, %v2818_v43 }
 0x119   : > { %3677 = vmatprep.mubr.msk.bf16.mxu1 %vm419_vm1, %v5279_v12 }
 0x120   : > { %3678 = vmatmul.mubr.msk.bf16.gmra.mrb[12].mxu1 %vm419_vm1, %v5299_v22 }
 0x1d3   : > { %v3827_v62 = vpop.f32.mrb[0].mxu0 }
 0x1d4   : > { %v2875_v40 = vpop.f32.mrb[1].mxu0 }
 0x1d5   : > { %v3828_v58 = vpop.f32.mrb[2].mxu0 }
 0x1d6   : > { %v2878_v29 = vpop.f32.mrb[3].mxu0 }
 0x1db   : > { %v3667_v16 = vpop.f32.mrb[0].mxu1  ;;  %v3831_v6 = vpop.f32.mrb[4].mxu0 }
 0x1dc   : > { %v3841_v4 = vadd.f32 %v3827_v62, %v3667_v16  ;;  %v1723_v60 = vpop.f32.mrb[1].mxu1  ;;  %v2891_v5 = vpop.f32.mrb[5].mxu0 }
 0x1dd   : > { %v3842_v55 = vadd.f32 %v2875_v40, %v1723_v60  ;;  %v3668_v10 = vpop.f32.mrb[2].mxu1  ;;  %v3832_v15 = vpop.f32.mrb[6].mxu0 }
 0x1de   : > { %v2963_v28 = vmul.f32 %v3841_v4, %v5515_v27  ;;  %v3843_v34 = vadd.f32 %v3828_v58, %v3668_v10  ;;  %v1726_v46 = vpop.f32.mrb[3].mxu1  ;;  %v2894_v32 = vpop.f32.mrb[7].mxu0 }
 0x1df   : > { %v2961_v37 = vmul.f32 %v3842_v55, %v5515_v27  ;;  %v3844_v14 = vadd.f32 %v2878_v29, %v1726_v46 }
 0x1e0   : > { %v2964_v9 = vmul.f32 %v3843_v34, %v5515_v27  ;;  %v2986_v11 = vadd.f32 %v5521_v33, %v2963_v28 }
 0x1e1   : > { %v2984_v42 = vadd.f32 %v5521_v33, %v2961_v37  ;;  %v2962_v61 = vmul.f32 %v3844_v14, %v5515_v27 }
 0x1e2   : > { %v2987_v26 = vadd.f32 %v5521_v33, %v2964_v9  ;;  %v3002_v31 = vmax.f32 %v2986_v11, 0.0 }
 0x1e3   : > { %v2985_v47 = vadd.f32 %v5521_v33, %v2962_v61  ;;  %v3671_v51 = vpop.f32.mrb[4].mxu1  ;;  %v3835_v12 = vpop.f32.mrb[8].mxu0  ;;  %v3000_v22 = vmax.f32 %v2984_v42, 0.0 }
 0x1e4   : > { %v3845_v21 = vadd.f32 %v3831_v6, %v3671_v51  ;;  %v1739_v39 = vpop.f32.mrb[5].mxu1  ;;  %v2907_v50 = vpop.f32.mrb[9].mxu0  ;;  %v3003_v36 = vmax.f32 %v2987_v26, 0.0 }
 0x1e5   : > { %v3001_v53 = vmax.f32 %v2985_v47, 0.0  ;;  %v3846_v43 = vadd.f32 %v2891_v5, %v1739_v39  ;;  %v3672_v25 = vpop.f32.mrb[6].mxu1  ;;  %v3836_v59 = vpop.f32.mrb[10].mxu0 }
 0x1e6   : > { %v3847_v18 = vadd.f32 %v3832_v15, %v3672_v25  ;;  %v1742_v13 = vpop.f32.mrb[7].mxu1  ;;  %v2910_v30 = vpop.f32.mrb[11].mxu0  ;;  %v2967_v52 = vmul.f32 %v3845_v21, %v5515_v27 }
 0x1e7   : > { %v3016_v57 = vadd.f32 %v3001_v53, %v3000_v22  ;;  %v2965_v7 = vmul.f32 %v3846_v43, %v5515_v27  ;;  %v3848_v0 = vadd.f32 %v2894_v32, %v1742_v13 }
 0x1e8   : > { %v2968_v20 = vmul.f32 %v3847_v18, %v5515_v27  ;;  %v2990_v35 = vadd.f32 %v5521_v33, %v2967_v52 }
 0x1e9   : > { %v3017_v48 = vadd.f32 %v3016_v57, %v3002_v31  ;;  %v2988_v19 = vadd.f32 %v5521_v33, %v2965_v7  ;;  %v2966_v24 = vmul.f32 %v3848_v0, %v5515_v27 }
 0x1ea   : > { %v2991_v44 = vadd.f32 %v5521_v33, %v2968_v20  ;;  %v3006_v16 = vmax.f32 %v2990_v35, 0.0 }
 0x1eb   : > { %v3004_v8 = vmax.f32 %v2988_v19, 0.0  ;;  %v3018_v2 = vadd.f32 %v3017_v48, %v3003_v36  ;;  %v2989_v38 = vadd.f32 %v5521_v33, %v2966_v24  ;;  %v3675_v17 = vpop.f32.mrb[8].mxu1  ;;  %v3839_v49 = vpop.f32.mrb[12].mxu0 }
 0x1ec   : > { %v3849_v23 = vadd.f32 %v3835_v12, %v3675_v17  ;;  %v1755_v63 = vpop.f32.mrb[9].mxu1  ;;  %v2923_v45 = vpop.f32.mrb[13].mxu0  ;;  %v3007_v55 = vmax.f32 %v2991_v44, 0.0 }
 0x1ed   : > { %v3019_v3 = vadd.f32 %v3018_v2, %v3004_v8  ;;  %v3005_v41 = vmax.f32 %v2989_v38, 0.0  ;;  %v3850_v56 = vadd.f32 %v2907_v50, %v1755_v63  ;;  %v3676_v1 = vpop.f32.mrb[10].mxu1  ;;  %v3840_v54 = vpop.f32.mrb[14].mxu0 }
 0x1ee   : > { %v2971_v62 = vmul.f32 %v3849_v23, %v5515_v27  ;;  %v3851_v40 = vadd.f32 %v3836_v59, %v3676_v1  ;;  %v1758_v58 = vpop.f32.mrb[11].mxu1  ;;  %v2926_v29 = vpop.f32.mrb[15].mxu0 }
 0x1ef   : > { %v3020_v6 = vadd.f32 %v3019_v3, %v3005_v41  ;;  %v2969_v4 = vmul.f32 %v3850_v56, %v5515_v27  ;;  %v3852_v60 = vadd.f32 %v2910_v30, %v1758_v58 }
 0x1f0   : > { %v2972_v5 = vmul.f32 %v3851_v40, %v5515_v27  ;;  %v2994_v34 = vadd.f32 %v5521_v33, %v2971_v62 }
 0x1f1   : > { %v3021_v10 = vadd.f32 %v3020_v6, %v3006_v16  ;;  %v2992_v15 = vadd.f32 %v5521_v33, %v2969_v4  ;;  %v2970_v28 = vmul.f32 %v3852_v60, %v5515_v27 }
 0x1f2   : > { %v2995_v14 = vadd.f32 %v5521_v33, %v2972_v5  ;;  %v3010_v12 = vmax.f32 %v2994_v34, 0.0 }
 0x1f3   : > { %v3022_v46 = vadd.f32 %v3021_v10, %v3007_v55  ;;  %v2993_v32 = vadd.f32 %v5521_v33, %v2970_v28  ;;  %v3679_v37 = vpop.f32.mrb[12].mxu1  ;;  %v3008_v61 = vmax.f32 %v2992_v15, 0.0 }
 0x1f4   : > { %v3853_v9 = vadd.f32 %v3839_v49, %v3679_v37  ;;  %v1771_v42 = vpop.f32.mrb[13].mxu1  ;;  %v3011_v25 = vmax.f32 %v2995_v14, 0.0 }
 0x1f5   : > { %v3009_v11 = vmax.f32 %v2993_v32, 0.0  ;;  %v3854_v47 = vadd.f32 %v2923_v45, %v1771_v42  ;;  %v3680_v51 = vpop.f32.mrb[14].mxu1  ;;  %v3023_v43 = vrot.slane %v3022_v46, 4 }
 0x1f6   : > { %v3855_v26 = vadd.f32 %v3840_v54, %v3680_v51  ;;  %v1774_v21 = vpop.f32.mrb[15].mxu1  ;;  %v2975_v50 = vmul.f32 %v3853_v9, %v5515_v27 }
 0x1f7   : > { %v3029_v39 = vadd.f32 %v3009_v11, %v3008_v61  ;;  %v2973_v22 = vmul.f32 %v3854_v47, %v5515_v27  ;;  %v3856_v53 = vadd.f32 %v2926_v29, %v1774_v21  ;;  %v3024_v0 = vadd.f32 %v3023_v43, %v3022_v46 }
 0x1f8   : > { %v2976_v18 = vmul.f32 %v3855_v26, %v5515_v27  ;;  %v2998_v30 = vadd.f32 %v5521_v33, %v2975_v50 }
 0x1f9   : > { %v3030_v59 = vadd.f32 %v3029_v39, %v3010_v12  ;;  %v2996_v31 = vadd.f32 %v5521_v33, %v2973_v22  ;;  %v2974_v13 = vmul.f32 %v3856_v53, %v5515_v27  ;;  %v3025_v2 = vrot.slane %v3024_v0, 2 }
 0x1fa   : > { %v2999_v48 = vadd.f32 %v5521_v33, %v2976_v18  ;;  %v3014_v20 = vmax.f32 %v2998_v30, 0.0 }
 0x1fb   : > { %v3012_v57 = vmax.f32 %v2996_v31, 0.0  ;;  %v3031_v52 = vadd.f32 %v3030_v59, %v3011_v25  ;;  %v2997_v7 = vadd.f32 %v5521_v33, %v2974_v13  ;;  %v3026_v17 = vadd.f32 %v3025_v2, %v3024_v0 }
 0x1fc   : > { %v3015_v35 = vmax.f32 %v2999_v48, 0.0 }
 0x1fd   : > { %v3032_v36 = vadd.f32 %v3031_v52, %v3012_v57  ;;  %v3013_v19 = vmax.f32 %v2997_v7, 0.0  ;;  %v3027_v23 = vrot.slane %v3026_v17, 1 }
 0x1ff   : > { %v3033_v24 = vadd.f32 %v3032_v36, %v3013_v19  ;;  %v3028_v3 = vadd.f32 %v3027_v23, %v3026_v17 }
 0x201   : > { %v3034_v8 = vadd.f32 %v3033_v24, %v3014_v20  ;;  %v3042_v41 = vmul.f32 0.015625, %v3028_v3 }
 0x203   : > { %v3035_v38 = vadd.f32 %v3034_v8, %v3015_v35 }
 0x205   : > { %v3036_v27 = vrot.slane %v3035_v38, 4 }
 0x207   : > { %v3037_v49 = vadd.f32 %v3036_v27, %v3035_v38 }
 0x209   : > { %v3038_v63 = vrot.slane %v3037_v49, 2 }
 0x20b   : > { %v3039_v45 = vadd.f32 %v3038_v63, %v3037_v49 }
 0x20d   : > { %v3040_v44 = vrot.slane %v3039_v45, 1 }
 0x20f   : > { %v3041_v33 = vadd.f32 %v3040_v44, %v3039_v45 }
 0x211   : > { %v3043_v56 = vmul.f32 0.015625, %v3041_v33 }
 0x213   : > { %v3047_v1 = vsel %vm3046_vm5, %v3043_v56, %v3042_v41 }
 0x214   : > { %3049 = vst [vmem:[%s193_s9] sm:$0x3] %v3047_v1 }
 0x215   : > { %4202 = shalt.err (!%p4199_p3)
}
 0x216   : > { %s4203_s28 = scalar_lea.hbm %s5559_s13, 32  ;;  %s4207_s23 = scalar_lea.hbm %s5605_s4, 64 }
 0x217   : > { %p4204_p4 = scmp.ne.s32.totalorder %s5559_s13, %s4203_s28  ;;  %p4208_p9 = scmp.lt.u32.totalorder %s5559_s13, %s5605_s4 }
 0x218   : > { %p4209_p10 = scmp.lt.u32.totalorder %s4207_s23, %s4203_s28  ;;  %p4211_p12 = scmp.lt.u32.totalorder %s4203_s28, %s5559_s13 }
 0x219   : > { %p4205_p7 = pnand %p4204_p4, %p4317_p5 }
 0x21a   : > { %p4210_p11 = por %p4209_p10, %p4208_p9 }
 0x21b   : > { %p4206_p8 = pneg %p4205_p7 }
 0x21c   : > { %p4212_p13 = por %p4211_p12, %p4210_p11 }
 0x21e   : > { %p4213_p0 = pnand %p4212_p13, %p4206_p8 }
 0x220   : > { %4216 = shalt.err (!%p4213_p0)
}
 0x221   : > { %4098 = dma.vmem_to_hbm [thread:$0]  (%p4317_p5), %s5561_s10, 32, %s5559_s13, %s3051_s14  }
 0x222 PF: > { %p4104_p1 = scmp.ge.s32.totalorder %s4251_s18, 2  ;;  %s3076_s7 = sand.u32 1, %s4239_s15  }
 0x223   : > { %s3077_s8 = scalar_lea.sflag [#allocation3], %s3076_s7 }
 0x224   : > { %p4101_p2 = pnand %p4104_p1, %p4321_p6 }
 0x226   : > { %4234 = dma.done.wait (!%p4101_p2), %s3077_s8, 32  }
 0x227   : > { %4236 = vsyncadd (!%p4101_p2), %s3077_s8, 4294967264  ;;  %p14_p3 = scmp.ge.s32.totalorder %s4304_s21, 4   ;;  %s5861_s15 = smov %s4243_s16 }
 0x228   : > { %s5862_s16 = smov %s4247_s17  ;;  %s5863_s17 = smov %s4315_s24 }
 0x229   : > { %s5864_s18 = smov %s4304_s21  ;;  %16 = sbr.rel (!%p14_p3) target bundleno = 3 (0x3), region = 86 }
 0x230   :  { %3082 = vsyncpa [#allocation3], 1 }
 0x231   :  { %3084 = vsyncpa [#allocation3 + $0x1], 1 }

</bundles_post_ra>
